<compile_context>
chip_gen: v7x
topology: tpu7x:2x2x1
jax: 0.10.0
libtpu: 0.0.40
codegen_flags: <defaults>
</compile_context>

<pallas_src>
import numpy as np

import jax
import jax.numpy as jnp
from jax.experimental import pallas as pl
from jax.experimental.pallas import tpu as pltpu

HI = jax.lax.Precision.HIGHEST
LANE = 128


# -----------------------------------------------------------------------------
# Setup-time: fold a 3x3 conv (PyTorch [Cout,Cin,KH,KW] weights) into a dense
# matmul matrix M [Cin*H*W, Cout*Ho*Wo] + bias row B [1, Cout*Ho*Wo], with both
# the row and column orderings in PyTorch (c, h, w) flatten order.
# -----------------------------------------------------------------------------
def conv_as_dense_matmul(w, b, in_hw, stride, padding):
    cout, cin, kh, kw = w.shape
    H, W = in_hw
    Ho = (H + 2 * padding - kh) // stride + 1
    Wo = (W + 2 * padding - kw) // stride + 1
    rows, cols, widx = [], [], []
    for co in range(cout):
        for ci in range(cin):
            for ki in range(kh):
                for kj in range(kw):
                    flat_w = ((co * cin + ci) * kh + ki) * kw + kj
                    for oh in range(Ho):
                        ih = oh * stride + ki - padding
                        if ih < 0 or ih >= H:
                            continue
                        for ow in range(Wo):
                            iw = ow * stride + kj - padding
                            if iw < 0 or iw >= W:
                                continue
                            rows.append(ci * H * W + ih * W + iw)
                            cols.append(co * Ho * Wo + oh * Wo + ow)
                            widx.append(flat_w)
    rows = np.asarray(rows)
    cols = np.asarray(cols)
    widx = np.asarray(widx)
    M = jnp.zeros((cin * H * W, cout * Ho * Wo), jnp.float32)
    M = M.at[rows, cols].set(w.reshape(-1)[widx].astype(jnp.float32))
    B = jnp.repeat(b.astype(jnp.float32), Ho * Wo).reshape(1, cout * Ho * Wo)
    return M, B, (Ho, Wo)


# -----------------------------------------------------------------------------
# Pallas kernel: entire forward pass fused.  x block is (BM, 256) f32; all
# weights (bf16) / biases (f32) are full-array VMEM residents; intermediates
# never touch HBM.
# -----------------------------------------------------------------------------
def _fused_forward_kernel(x_ref,
                          m1_ref, b1_ref,          # conv1 as dense matmul
                          m2_ref, b2_ref,          # conv2 as dense matmul
                          fc0w_ref, fc0b_ref,      # encoder fc0 (out padded to 128)
                          fc1w_ref, fc1b_ref,      # encoder fc1 -> gen seed (padded to 128)
                          dec0w_ref, dec0b_ref,    # decoder stand-in (padded to 128)
                          dec1w_ref, dec1b_ref,
                          o_ref):
    def dense(h, w_ref, b_ref):
        # bf16 operands -> native-bf16 MXU on v5e/v6e/v7x; f32 accumulation;
        # bias-add (and the caller's ReLU / sigmoid) stay f32.
        return jnp.dot(h.astype(jnp.bfloat16), w_ref[...],
                       preferred_element_type=jnp.float32) + b_ref[...]

    h = x_ref[...]                                             # (BM, 256)  f32
    h = jnp.maximum(dense(h, m1_ref, b1_ref), 0.0)             # conv1 + ReLU            -> (BM, 1024)
    h = jnp.maximum(dense(h, m2_ref, b2_ref), 0.0)             # conv2 + ReLU            -> (BM, 512)
    h = jnp.maximum(dense(h, fc0w_ref, fc0b_ref), 0.0)         # fc0 + ReLU (+dropout=id)-> (BM, 128)
    h = jnp.maximum(dense(h, fc1w_ref, fc1b_ref), 0.0)         # fc1 + ReLU              -> (BM, 128)
    h = jnp.maximum(dense(h, dec0w_ref, dec0b_ref), 0.0)       # dec0 + ReLU             -> (BM, 128)
    h = dense(h, dec1w_ref, dec1b_ref)                         # dec1                    -> (BM, 256)
    o_ref[...] = jax.nn.sigmoid(h).astype(o_ref.dtype)


def fused_autoencoder_call(kp, x_flat, bm):
    npad, din = x_flat.shape
    dout = kp["dec1_w"].shape[1]
    weights = [kp["m1"], kp["b1"], kp["m2"], kp["b2"],
               kp["fc0_w"], kp["fc0_b"], kp["fc1_w"], kp["fc1_b"],
               kp["dec0_w"], kp["dec0_b"], kp["dec1_w"], kp["dec1_b"]]
    w_specs = [pl.BlockSpec(w.shape, lambda i: (0, 0)) for w in weights]

    mm_keys = ["m1", "m2", "fc0_w", "fc1_w", "dec0_w", "dec1_w"]
    flops = int(2 * npad * sum(kp[k].shape[0] * kp[k].shape[1] for k in mm_keys))
    bytes_accessed = int(sum(int(np.prod(w.shape)) * w.dtype.itemsize for w in weights)
                         + (npad * din + npad * dout) * 4)

    return pl.pallas_call(
        _fused_forward_kernel,
        out_shape=jax.ShapeDtypeStruct((npad, dout), jnp.float32),
        grid=(npad // bm,),
        in_specs=[pl.BlockSpec((bm, din), lambda i: (i, 0))] + w_specs,
        out_specs=pl.BlockSpec((bm, dout), lambda i: (i, 0)),
        compiler_params=pltpu.CompilerParams(
            dimension_semantics=("parallel",)),   # grid>=2 at n>=9 -> both v7x TCs busy
        cost_estimate=pl.CostEstimate(
            flops=flops, transcendentals=int(npad * dout), bytes_accessed=bytes_accessed),
    )(x_flat, *weights)


# -----------------------------------------------------------------------------
# Parameters (PyTorch-layout) and one-time preprocessing into kernel layout.
# -----------------------------------------------------------------------------
def make_params(key):
    keys = jax.random.split(key, 12)
    scale = 0.1
    p = {}
    p["conv1_w"] = scale * jax.random.normal(keys[0], (4, 1, 3, 3), jnp.float32)
    p["conv1_b"] = scale * jax.random.normal(keys[1], (4,), jnp.float32)
    p["conv2_w"] = scale * jax.random.normal(keys[2], (8, 4, 3, 3), jnp.float32)
    p["conv2_b"] = scale * jax.random.normal(keys[3], (8,), jnp.float32)
    p["fc0_w"] = scale * jax.random.normal(keys[4], (512, 32), jnp.float32)   # flatten 8*8*8 -> 32
    p["fc0_b"] = scale * jax.random.normal(keys[5], (32,), jnp.float32)
    p["fc1_w"] = scale * jax.random.normal(keys[6], (32, 16), jnp.float32)    # -> gen_seed_len
    p["fc1_b"] = scale * jax.random.normal(keys[7], (16,), jnp.float32)
    p["dec0_w"] = scale * jax.random.normal(keys[8], (16, 64), jnp.float32)
    p["dec0_b"] = scale * jax.random.normal(keys[9], (64,), jnp.float32)
    p["dec1_w"] = scale * jax.random.normal(keys[10], (64, 256), jnp.float32)
    p["dec1_b"] = scale * jax.random.normal(keys[11], (256,), jnp.float32)
    return p


def _pad_cols(a, n):
    return jnp.pad(a, [(0, 0)] * (a.ndim - 1) + [(0, n - a.shape[-1])])


def _pad_rows(a, n):
    return jnp.pad(a, [(0, n - a.shape[0])] + [(0, 0)] * (a.ndim - 1))


def preprocess_params(p):
    """One-time setup: dense conv matrices (rows in PyTorch (c,h,w) flatten order so the
    .view() flatten needs no runtime transpose), bf16 weights, f32 (1, N) biases, and all
    narrow layer widths zero-padded to a full 128-lane vreg (with matching zero K-rows in
    the next layer -> numerically identical)."""
    m1, b1, _ = conv_as_dense_matmul(p["conv1_w"], p["conv1_b"], (16, 16), stride=1, padding=1)
    m2, b2, _ = conv_as_dense_matmul(p["conv2_w"], p["conv2_b"], (16, 16), stride=2, padding=1)

    fc0_w = _pad_cols(p["fc0_w"], LANE)                          # (512, 128)
    fc0_b = _pad_cols(p["fc0_b"].reshape(1, -1), LANE)           # (1, 128)
    fc1_w = _pad_cols(_pad_rows(p["fc1_w"], LANE), LANE)         # (128, 128)
    fc1_b = _pad_cols(p["fc1_b"].reshape(1, -1), LANE)
    dec0_w = _pad_cols(_pad_rows(p["dec0_w"], LANE), LANE)       # (128, 128)
    dec0_b = _pad_cols(p["dec0_b"].reshape(1, -1), LANE)
    dec1_w = _pad_rows(p["dec1_w"], LANE)                        # (128, 256)
    dec1_b = p["dec1_b"].reshape(1, -1)

    bf = jnp.bfloat16
    f32 = jnp.float32
    return {
        "m1": m1.astype(bf), "b1": b1.astype(f32),
        "m2": m2.astype(bf), "b2": b2.astype(f32),
        "fc0_w": fc0_w.astype(bf), "fc0_b": fc0_b.astype(f32),
        "fc1_w": fc1_w.astype(bf), "fc1_b": fc1_b.astype(f32),
        "dec0_w": dec0_w.astype(bf), "dec0_b": dec0_b.astype(f32),
        "dec1_w": dec1_w.astype(bf), "dec1_b": dec1_b.astype(f32),
    }


# -----------------------------------------------------------------------------
# Forward pass: AutoEncoder(images), images NCHW f32.
# -----------------------------------------------------------------------------
def _pick_bm(n):
    if n <= 8:
        return 8
    # Half the batch per block (ceil) so the grid length is >= 2 (v7x: both TensorCores),
    # rounded up to a sublane multiple and capped at 256 (fills v6e's 256-wide MXU M dim,
    # amortizes the ~0.35us per-grid-step overhead; VMEM stays tiny either way).
    bm = -(-n // 2)
    bm = -(-bm // 8) * 8
    return min(256, bm)


def autoencoder_forward(kparams, images_nchw):
    n, c, h, w = images_nchw.shape
    # PyTorch (c, h, w) flatten order == dense conv-matrix row order: plain reshape, no transpose.
    x = images_nchw.reshape(n, c * h * w).astype(jnp.float32)     # (N, 256), lane-dense
    bm = _pick_bm(n)
    npad = -(-n // bm) * bm                                        # pad batch to block multiple
    if npad != n:
        x = jnp.pad(x, ((0, npad - n), (0, 0)))
    y = fused_autoencoder_call(kparams, x, bm)                     # (npad, 256), lane-dense
    return y[:n].reshape(n, c, h, w)


# -----------------------------------------------------------------------------
# Pure-JAX/XLA references.
#   operand_dtype=None     : faithful f32 / HIGHEST precision (the PyTorch-spec semantics).
#   operand_dtype=bfloat16 : quantization-matched to the kernel (bf16 dot operands,
#                            f32 accumulation / bias / activations) -> tight tolerance.
# -----------------------------------------------------------------------------
def reference_forward(p, images, operand_dtype=None):
    cast = (lambda a: a) if operand_dtype is None else (lambda a: a.astype(operand_dtype))
    prec = HI if operand_dtype is None else None
    n = images.shape[0]
    x = images.astype(jnp.float32)
    x = jax.lax.conv_general_dilated(cast(x), cast(p["conv1_w"]), (1, 1), [(1, 1), (1, 1)],
                                     dimension_numbers=("NCHW", "OIHW", "NCHW"),
                                     precision=prec, preferred_element_type=jnp.float32)
    x = jnp.maximum(x + p["conv1_b"].reshape(1, -1, 1, 1), 0.0)
    x = jax.lax.conv_general_dilated(cast(x), cast(p["conv2_w"]), (2, 2), [(1, 1), (1, 1)],
                                     dimension_numbers=("NCHW", "OIHW", "NCHW"),
                                     precision=prec, preferred_element_type=jnp.float32)
    x = jnp.maximum(x + p["conv2_b"].reshape(1, -1, 1, 1), 0.0)
    x = x.reshape(n, -1)

    def dense(h, w, b):
        return jnp.dot(cast(h), cast(w), precision=prec,
                       preferred_element_type=jnp.float32) + b

    x = jnp.maximum(dense(x, p["fc0_w"], p["fc0_b"]), 0.0)
    x = jnp.maximum(dense(x, p["fc1_w"], p["fc1_b"]), 0.0)
    x = jnp.maximum(dense(x, p["dec0_w"], p["dec0_b"]), 0.0)
    x = jax.nn.sigmoid(dense(x, p["dec1_w"], p["dec1_b"]))
    return x.reshape(n, 1, 16, 16)


if __name__ == "__main__":
    key = jax.random.PRNGKey(0)
    pkey, xkey, xkey2 = jax.random.split(key, 3)
    params = make_params(pkey)
    kparams = preprocess_params(params)   # one-time setup (not on the per-call path)

    fwd = jax.jit(autoencoder_forward)
    ref_f32 = jax.jit(lambda im: reference_forward(params, im))
    ref_bf16 = jax.jit(lambda im: reference_forward(params, im, operand_dtype=jnp.bfloat16))

    # ---- small batch (n=2, bm=8, grid=1): NCHW, as PyTorch expects ----
    images = jax.random.uniform(xkey, (2, 1, 16, 16), jnp.float32)
    out = jax.block_until_ready(fwd(kparams, images))
    assert out.shape == (2, 1, 16, 16), out.shape
    assert out.dtype == jnp.float32
    assert bool(jnp.all(jnp.isfinite(out)))

    # Kernel mechanics: compare against a quantization-matched XLA reference (tight).
    np.testing.assert_allclose(np.asarray(out), np.asarray(ref_bf16(images)),
                               rtol=2e-4, atol=2e-4)
    # Spec fidelity: compare against the full-f32 reference (bf16 quantization budget).
    np.testing.assert_allclose(np.asarray(out), np.asarray(ref_f32(images)),
                               rtol=1e-2, atol=1e-2)

    # ---- larger batch (n=20 -> bm=16, npad=32, grid=2): exercises batch padding and
    #      the multi-block "parallel" path (both TensorCores on v7x) ----
    images2 = jax.random.uniform(xkey2, (20, 1, 16, 16), jnp.float32)
    out2 = jax.block_until_ready(fwd(kparams, images2))
    assert out2.shape == (20, 1, 16, 16), out2.shape
    assert bool(jnp.all(jnp.isfinite(out2)))
    np.testing.assert_allclose(np.asarray(out2), np.asarray(ref_bf16(images2)),
                               rtol=2e-4, atol=2e-4)
    np.testing.assert_allclose(np.asarray(out2), np.asarray(ref_f32(images2)),
                               rtol=1e-2, atol=1e-2)

    print("KERNEL_OK")
</pallas_src>

<mosaic_0001>
module attributes {stable_mosaic.version = 11 : i64} {
  func.func @_fused_forward_kernel(%arg0: i32, %arg1: memref<8x256xf32, #tpu.memory_space<vmem>>, %arg2: memref<256x1024xbf16, #tpu.memory_space<vmem>>, %arg3: memref<1x1024xf32, #tpu.memory_space<vmem>>, %arg4: memref<1024x512xbf16, #tpu.memory_space<vmem>>, %arg5: memref<1x512xf32, #tpu.memory_space<vmem>>, %arg6: memref<512x128xbf16, #tpu.memory_space<vmem>>, %arg7: memref<1x128xf32, #tpu.memory_space<vmem>>, %arg8: memref<128x128xbf16, #tpu.memory_space<vmem>>, %arg9: memref<1x128xf32, #tpu.memory_space<vmem>>, %arg10: memref<128x128xbf16, #tpu.memory_space<vmem>>, %arg11: memref<1x128xf32, #tpu.memory_space<vmem>>, %arg12: memref<128x256xbf16, #tpu.memory_space<vmem>>, %arg13: memref<1x256xf32, #tpu.memory_space<vmem>>, %arg14: memref<8x256xf32, #tpu.memory_space<vmem>>) attributes {dimension_semantics = [#tpu.dimension_semantics<parallel>], iteration_bounds = array<i64: 1>, scalar_prefetch = 0 : i64, scratch_operands = 0 : i64, tpu.core_type = #tpu.core_type<tc>, window_params = [{transform_indices = @transform_0, window_bounds = array<i64: 8, 256>}, {pipeline_mode = #tpu.pipeline_mode<synchronous>, transform_indices = @transform_1, window_bounds = array<i64: 256, 1024>}, {pipeline_mode = #tpu.pipeline_mode<synchronous>, transform_indices = @transform_2, window_bounds = array<i64: 1, 1024>}, {pipeline_mode = #tpu.pipeline_mode<synchronous>, transform_indices = @transform_3, window_bounds = array<i64: 1024, 512>}, {pipeline_mode = #tpu.pipeline_mode<synchronous>, transform_indices = @transform_4, window_bounds = array<i64: 1, 512>}, {pipeline_mode = #tpu.pipeline_mode<synchronous>, transform_indices = @transform_5, window_bounds = array<i64: 512, 128>}, {pipeline_mode = #tpu.pipeline_mode<synchronous>, transform_indices = @transform_6, window_bounds = array<i64: 1, 128>}, {pipeline_mode = #tpu.pipeline_mode<synchronous>, transform_indices = @transform_7, window_bounds = array<i64: 128, 128>}, {pipeline_mode = #tpu.pipeline_mode<synchronous>, transform_indices = @transform_8, window_bounds = array<i64: 1, 128>}, {pipeline_mode = #tpu.pipeline_mode<synchronous>, transform_indices = @transform_9, window_bounds = array<i64: 128, 128>}, {pipeline_mode = #tpu.pipeline_mode<synchronous>, transform_indices = @transform_10, window_bounds = array<i64: 1, 128>}, {pipeline_mode = #tpu.pipeline_mode<synchronous>, transform_indices = @transform_11, window_bounds = array<i64: 128, 256>}, {pipeline_mode = #tpu.pipeline_mode<synchronous>, transform_indices = @transform_12, window_bounds = array<i64: 1, 256>}, {transform_indices = @transform_13, window_bounds = array<i64: 8, 256>}]} {
    %c0 = arith.constant 0 : index
    %c0_0 = arith.constant 0 : index
    %0 = vector.load %arg1[%c0, %c0_0] : memref<8x256xf32, #tpu.memory_space<vmem>>, vector<8x256xf32>
    %1 = arith.truncf %0 : vector<8x256xf32> to vector<8x256xbf16>
    %c0_1 = arith.constant 0 : index
    %c0_2 = arith.constant 0 : index
    %2 = vector.load %arg2[%c0_1, %c0_2] : memref<256x1024xbf16, #tpu.memory_space<vmem>>, vector<256x1024xbf16>
    %cst = arith.constant dense<0.000000e+00> : vector<8x1024xf32>
    %3 = tpu.matmul %1, %2, %cst {dimension_numbers = #tpu.dot_dimension_numbers<[1], [0], [0], [1], [0, 0, 1, 1], [], []>} : vector<8x256xbf16>, vector<256x1024xbf16>, vector<8x1024xf32> -> vector<8x1024xf32>
    %c0_3 = arith.constant 0 : index
    %c0_4 = arith.constant 0 : index
    %4 = vector.load %arg3[%c0_3, %c0_4] : memref<1x1024xf32, #tpu.memory_space<vmem>>, vector<1x1024xf32>
    %5 = vector.broadcast %4 : vector<1x1024xf32> to vector<8x1024xf32>
    %6 = arith.addf %3, %5 : vector<8x1024xf32>
    %cst_5 = arith.constant 0.000000e+00 : f32
    %7 = vector.broadcast %cst_5 : f32 to vector<8x1024xf32>
    %8 = arith.maximumf %6, %7 : vector<8x1024xf32>
    %9 = arith.truncf %8 : vector<8x1024xf32> to vector<8x1024xbf16>
    %c0_6 = arith.constant 0 : index
    %c0_7 = arith.constant 0 : index
    %10 = vector.load %arg4[%c0_6, %c0_7] : memref<1024x512xbf16, #tpu.memory_space<vmem>>, vector<1024x512xbf16>
    %cst_8 = arith.constant dense<0.000000e+00> : vector<8x512xf32>
    %11 = tpu.matmul %9, %10, %cst_8 {dimension_numbers = #tpu.dot_dimension_numbers<[1], [0], [0], [1], [0, 0, 1, 1], [], []>} : vector<8x1024xbf16>, vector<1024x512xbf16>, vector<8x512xf32> -> vector<8x512xf32>
    %c0_9 = arith.constant 0 : index
    %c0_10 = arith.constant 0 : index
    %12 = vector.load %arg5[%c0_9, %c0_10] : memref<1x512xf32, #tpu.memory_space<vmem>>, vector<1x512xf32>
    %13 = vector.broadcast %12 : vector<1x512xf32> to vector<8x512xf32>
    %14 = arith.addf %11, %13 : vector<8x512xf32>
    %cst_11 = arith.constant 0.000000e+00 : f32
    %15 = vector.broadcast %cst_11 : f32 to vector<8x512xf32>
    %16 = arith.maximumf %14, %15 : vector<8x512xf32>
    %17 = arith.truncf %16 : vector<8x512xf32> to vector<8x512xbf16>
    %c0_12 = arith.constant 0 : index
    %c0_13 = arith.constant 0 : index
    %18 = vector.load %arg6[%c0_12, %c0_13] : memref<512x128xbf16, #tpu.memory_space<vmem>>, vector<512x128xbf16>
    %cst_14 = arith.constant dense<0.000000e+00> : vector<8x128xf32>
    %19 = tpu.matmul %17, %18, %cst_14 {dimension_numbers = #tpu.dot_dimension_numbers<[1], [0], [0], [1], [0, 0, 1, 1], [], []>} : vector<8x512xbf16>, vector<512x128xbf16>, vector<8x128xf32> -> vector<8x128xf32>
    %c0_15 = arith.constant 0 : index
    %c0_16 = arith.constant 0 : index
    %20 = vector.load %arg7[%c0_15, %c0_16] : memref<1x128xf32, #tpu.memory_space<vmem>>, vector<1x128xf32>
    %21 = vector.broadcast %20 : vector<1x128xf32> to vector<8x128xf32>
    %22 = arith.addf %19, %21 : vector<8x128xf32>
    %cst_17 = arith.constant 0.000000e+00 : f32
    %23 = vector.broadcast %cst_17 : f32 to vector<8x128xf32>
    %24 = arith.maximumf %22, %23 : vector<8x128xf32>
    %25 = arith.truncf %24 : vector<8x128xf32> to vector<8x128xbf16>
    %c0_18 = arith.constant 0 : index
    %c0_19 = arith.constant 0 : index
    %26 = vector.load %arg8[%c0_18, %c0_19] : memref<128x128xbf16, #tpu.memory_space<vmem>>, vector<128x128xbf16>
    %cst_20 = arith.constant dense<0.000000e+00> : vector<8x128xf32>
    %27 = tpu.matmul %25, %26, %cst_20 {dimension_numbers = #tpu.dot_dimension_numbers<[1], [0], [0], [1], [0, 0, 1, 1], [], []>} : vector<8x128xbf16>, vector<128x128xbf16>, vector<8x128xf32> -> vector<8x128xf32>
    %c0_21 = arith.constant 0 : index
    %c0_22 = arith.constant 0 : index
    %28 = vector.load %arg9[%c0_21, %c0_22] : memref<1x128xf32, #tpu.memory_space<vmem>>, vector<1x128xf32>
    %29 = vector.broadcast %28 : vector<1x128xf32> to vector<8x128xf32>
    %30 = arith.addf %27, %29 : vector<8x128xf32>
    %cst_23 = arith.constant 0.000000e+00 : f32
    %31 = vector.broadcast %cst_23 : f32 to vector<8x128xf32>
    %32 = arith.maximumf %30, %31 : vector<8x128xf32>
    %33 = arith.truncf %32 : vector<8x128xf32> to vector<8x128xbf16>
    %c0_24 = arith.constant 0 : index
    %c0_25 = arith.constant 0 : index
    %34 = vector.load %arg10[%c0_24, %c0_25] : memref<128x128xbf16, #tpu.memory_space<vmem>>, vector<128x128xbf16>
    %cst_26 = arith.constant dense<0.000000e+00> : vector<8x128xf32>
    %35 = tpu.matmul %33, %34, %cst_26 {dimension_numbers = #tpu.dot_dimension_numbers<[1], [0], [0], [1], [0, 0, 1, 1], [], []>} : vector<8x128xbf16>, vector<128x128xbf16>, vector<8x128xf32> -> vector<8x128xf32>
    %c0_27 = arith.constant 0 : index
    %c0_28 = arith.constant 0 : index
    %36 = vector.load %arg11[%c0_27, %c0_28] : memref<1x128xf32, #tpu.memory_space<vmem>>, vector<1x128xf32>
    %37 = vector.broadcast %36 : vector<1x128xf32> to vector<8x128xf32>
    %38 = arith.addf %35, %37 : vector<8x128xf32>
    %cst_29 = arith.constant 0.000000e+00 : f32
    %39 = vector.broadcast %cst_29 : f32 to vector<8x128xf32>
    %40 = arith.maximumf %38, %39 : vector<8x128xf32>
    %41 = arith.truncf %40 : vector<8x128xf32> to vector<8x128xbf16>
    %c0_30 = arith.constant 0 : index
    %c0_31 = arith.constant 0 : index
    %42 = vector.load %arg12[%c0_30, %c0_31] : memref<128x256xbf16, #tpu.memory_space<vmem>>, vector<128x256xbf16>
    %cst_32 = arith.constant dense<0.000000e+00> : vector<8x256xf32>
    %43 = tpu.matmul %41, %42, %cst_32 {dimension_numbers = #tpu.dot_dimension_numbers<[1], [0], [0], [1], [0, 0, 1, 1], [], []>} : vector<8x128xbf16>, vector<128x256xbf16>, vector<8x256xf32> -> vector<8x256xf32>
    %c0_33 = arith.constant 0 : index
    %c0_34 = arith.constant 0 : index
    %44 = vector.load %arg13[%c0_33, %c0_34] : memref<1x256xf32, #tpu.memory_space<vmem>>, vector<1x256xf32>
    %45 = vector.broadcast %44 : vector<1x256xf32> to vector<8x256xf32>
    %46 = arith.addf %43, %45 : vector<8x256xf32>
    %47 = arith.negf %46 : vector<8x256xf32>
    %48 = math.exp %47 : vector<8x256xf32>
    %cst_35 = arith.constant 1.000000e+00 : f32
    %49 = vector.broadcast %cst_35 : f32 to vector<8x256xf32>
    %50 = arith.addf %49, %48 : vector<8x256xf32>
    %51 = arith.divf %49, %50 : vector<8x256xf32>
    %c0_36 = arith.constant 0 : index
    %c0_37 = arith.constant 0 : index
    %52 = vector.load %arg14[%c0_36, %c0_37] : memref<8x256xf32, #tpu.memory_space<vmem>>, vector<8x256xf32>
    tpu.vector_store %arg14[%c0_36, %c0_37], %51 {strides = array<i32>} : memref<8x256xf32, #tpu.memory_space<vmem>>, vector<8x256xf32>,
    return
  }
  func.func @transform_0(%arg0: i32) -> (i32, i32) {
    %c0_i32 = arith.constant 0 : i32
    %c0_i32_0 = arith.constant 0 : i32
    return %arg0, %c0_i32 : i32, i32
  }
  func.func @transform_1(%arg0: i32) -> (i32, i32) {
    %c0_i32 = arith.constant 0 : i32
    %c0_i32_0 = arith.constant 0 : i32
    %c0_i32_1 = arith.constant 0 : i32
    return %c0_i32, %c0_i32_0 : i32, i32
  }
  func.func @transform_2(%arg0: i32) -> (i32, i32) {
    %c0_i32 = arith.constant 0 : i32
    %c0_i32_0 = arith.constant 0 : i32
    %c0_i32_1 = arith.constant 0 : i32
    return %c0_i32, %c0_i32_0 : i32, i32
  }
  func.func @transform_3(%arg0: i32) -> (i32, i32) {
    %c0_i32 = arith.constant 0 : i32
    %c0_i32_0 = arith.constant 0 : i32
    %c0_i32_1 = arith.constant 0 : i32
    return %c0_i32, %c0_i32_0 : i32, i32
  }
  func.func @transform_4(%arg0: i32) -> (i32, i32) {
    %c0_i32 = arith.constant 0 : i32
    %c0_i32_0 = arith.constant 0 : i32
    %c0_i32_1 = arith.constant 0 : i32
    return %c0_i32, %c0_i32_0 : i32, i32
  }
  func.func @transform_5(%arg0: i32) -> (i32, i32) {
    %c0_i32 = arith.constant 0 : i32
    %c0_i32_0 = arith.constant 0 : i32
    %c0_i32_1 = arith.constant 0 : i32
    return %c0_i32, %c0_i32_0 : i32, i32
  }
  func.func @transform_6(%arg0: i32) -> (i32, i32) {
    %c0_i32 = arith.constant 0 : i32
    %c0_i32_0 = arith.constant 0 : i32
    %c0_i32_1 = arith.constant 0 : i32
    return %c0_i32, %c0_i32_0 : i32, i32
  }
  func.func @transform_7(%arg0: i32) -> (i32, i32) {
    %c0_i32 = arith.constant 0 : i32
    %c0_i32_0 = arith.constant 0 : i32
    %c0_i32_1 = arith.constant 0 : i32
    return %c0_i32, %c0_i32_0 : i32, i32
  }
  func.func @transform_8(%arg0: i32) -> (i32, i32) {
    %c0_i32 = arith.constant 0 : i32
    %c0_i32_0 = arith.constant 0 : i32
    %c0_i32_1 = arith.constant 0 : i32
    return %c0_i32, %c0_i32_0 : i32, i32
  }
  func.func @transform_9(%arg0: i32) -> (i32, i32) {
    %c0_i32 = arith.constant 0 : i32
    %c0_i32_0 = arith.constant 0 : i32
    %c0_i32_1 = arith.constant 0 : i32
    return %c0_i32, %c0_i32_0 : i32, i32
  }
  func.func @transform_10(%arg0: i32) -> (i32, i32) {
    %c0_i32 = arith.constant 0 : i32
    %c0_i32_0 = arith.constant 0 : i32
    %c0_i32_1 = arith.constant 0 : i32
    return %c0_i32, %c0_i32_0 : i32, i32
  }
  func.func @transform_11(%arg0: i32) -> (i32, i32) {
    %c0_i32 = arith.constant 0 : i32
    %c0_i32_0 = arith.constant 0 : i32
    %c0_i32_1 = arith.constant 0 : i32
    return %c0_i32, %c0_i32_0 : i32, i32
  }
  func.func @transform_12(%arg0: i32) -> (i32, i32) {
    %c0_i32 = arith.constant 0 : i32
    %c0_i32_0 = arith.constant 0 : i32
    %c0_i32_1 = arith.constant 0 : i32
    return %c0_i32, %c0_i32_0 : i32, i32
  }
  func.func @transform_13(%arg0: i32) -> (i32, i32) {
    %c0_i32 = arith.constant 0 : i32
    %c0_i32_0 = arith.constant 0 : i32
    return %arg0, %c0_i32 : i32, i32
  }
}

</mosaic_0001>

<bundles_post_ra>
// kernel: autoencoder_forward.1
= control target key start
LH: loop header
LB: loop body
LE: loop exit
PB: predicated region body
PF: predicated region fallthrough
CT: control target
= control target key end

     0   :  { %18 = vsyncpa [#allocation3], 0  ;;  %s5405_s0 = inlined_call_operand.vmem [shape: f32[8,256], index: 0, kind: input, shape index: {}]   ;;  %s5406_s1 = inlined_call_operand.hbm [shape: bf16[256,1024], index: 1, kind: input, shape index: {}]   ;;  %s5407_s2 = inlined_call_operand.hbm [shape: f32[1,1024], index: 2, kind: input, shape index: {}]   ;;  %s5408_s3 = inlined_call_operand.hbm [shape: bf16[1024,512], index: 3, kind: input, shape index: {}]   ;;  %s5409_s4 = inlined_call_operand.vmem [shape: f32[1,512], index: 4, kind: input, shape index: {}]   ;;  %s5410_s5 = inlined_call_operand.hbm [shape: bf16[512,128], index: 5, kind: input, shape index: {}]   ;;  %s5411_s6 = inlined_call_operand.hbm [shape: f32[1,128], index: 6, kind: input, shape index: {}]   ;;  %s5412_s7 = inlined_call_operand.vmem [shape: bf16[128,128], index: 7, kind: input, shape index: {}]   ;;  %s5413_s8 = inlined_call_operand.hbm [shape: f32[1,128], index: 8, kind: input, shape index: {}]   ;;  %s5414_s9 = inlined_call_operand.hbm [shape: bf16[128,128], index: 9, kind: input, shape index: {}]   ;;  %s5415_s10 = inlined_call_operand.hbm [shape: f32[1,128], index: 10, kind: input, shape index: {}]   ;;  %s5416_s11 = inlined_call_operand.hbm [shape: bf16[128,256], index: 11, kind: input, shape index: {}]   ;;  %s5417_s12 = inlined_call_operand.vmem [shape: f32[1,256], index: 12, kind: input, shape index: {}]   ;;  %s5418_s13 = inlined_call_operand.vmem [shape: f32[8,256], index: 13, kind: output, shape index: {}]  }
   0x1   :  { %19 = vsyncpa [#allocation5], 0 }
   0x2   :  { %20 = vsyncpa [#allocation8], 0 }
   0x3   :  { %21 = vsyncpa [#allocation11], 0 }
   0x4   :  { %22 = vsyncpa [#allocation14], 0  ;;  %s5065_s25 = smov [#allocation4]   ;;  %s5066_s27 = smov [#allocation7]  }
   0x5   :  { %s43_s26 = sshll.u32 %s5065_s25, 4  ;;  %s66_s28 = sshll.u32 %s5066_s27, 4  ;;  %s44_s26 = int_to_ptr.vmem [resolvable:$true] %s43_s26  ;;  %s5155_s28 = int_to_ptr.vmem [resolvable:$true] %s66_s28 }
   0x6   :  { %s4857_s14 = scalar_lea.hbm %s5407_s2, 128 }
   0x7   :  { %p4858_p0 = scmp.ne.s32.totalorder %s5407_s2, %s4857_s14  ;;  %p4861_p1 = scmp.lt.u32.totalorder %s4857_s14, %s5407_s2 }
   0x9   :  { %p4863_p2 = pnand %p4861_p1, %p4858_p0 }
   0xb   :  { %4866 = shalt.err (!%p4863_p2)
}
   0xc   :  { %s4867_s19 = scalar_lea.vmem %s44_s26, 128  ;;  %p4872_p4 = scmp.lt.s32.totalorder %s44_s26, %s44_s26 }
   0xd   :  { %p4868_p3 = scmp.ne.s32.totalorder %s44_s26, %s4867_s19  ;;  %p4873_p5 = scmp.lt.s32.totalorder %s4867_s19, %s4867_s19 }
   0xf   :  { %p4874_p6 = por %p4873_p5, %p4872_p4 }
  0x11   :  { %p4875_p7 = pnand %p4874_p6, %p4868_p3 }
  0x13   :  { %4878 = shalt.err (!%p4875_p7)
}
  0x14   :  { %46 = dma.hbm_to_vmem [thread:$0]  %s5407_s2, 128, %s44_s26, [#allocation5]  }
  0x15   :  { %s4879_s24 = scalar_lea.hbm %s5410_s5, 4096 }
  0x16   :  { %p4880_p8 = scmp.ne.s32.totalorder %s5410_s5, %s4879_s24  ;;  %p4883_p9 = scmp.lt.u32.totalorder %s4879_s24, %s5410_s5 }
  0x18   :  { %p4885_p10 = pnand %p4883_p9, %p4880_p8 }
  0x1a   :  { %4888 = shalt.err (!%p4885_p10)
}
  0x1b   :  { %s4889_s14 = scalar_lea.vmem %s5155_s28, 4096  ;;  %p4894_p12 = scmp.lt.s32.totalorder %s5155_s28, %s5155_s28 }
  0x1c   :  { %p4890_p11 = scmp.ne.s32.totalorder %s5155_s28, %s4889_s14  ;;  %p4895_p13 = scmp.lt.s32.totalorder %s4889_s14, %s4889_s14 }
  0x1e   :  { %p4896_p0 = por %p4895_p13, %p4894_p12 }
  0x20   :  { %p4897_p1 = pnand %p4896_p0, %p4890_p11 }
  0x22   :  { %4900 = shalt.err (!%p4897_p1)
}
  0x23   :  { %s5067_s2 = smov 64   ;;  %s5068_s26 = smov 4  }
  0x24   :  { %72 = dma.hbm_to_vmem [thread:$0]  %s5410_s5, 4096, %s5155_s28, [#allocation8], %s5067_s2, %s5067_s2, %s5068_s26  }
  0x25   :  { %s5069_s17 = smov [#allocation10]   ;;  %s5070_s19 = smov [#allocation13]  }
  0x26   :  { %s91_s18 = sshll.u32 %s5069_s17, 4  ;;  %s113_s20 = sshll.u32 %s5070_s19, 4  ;;  %s92_s18 = int_to_ptr.vmem [resolvable:$true] %s91_s18  ;;  %s114_s20 = int_to_ptr.vmem [resolvable:$true] %s113_s20 }
  0x27   :  { %s4901_s23 = scalar_lea.hbm %s5413_s8, 16 }
  0x28   :  { %p4902_p2 = scmp.ne.s32.totalorder %s5413_s8, %s4901_s23  ;;  %p4905_p3 = scmp.lt.u32.totalorder %s4901_s23, %s5413_s8 }
  0x2a   :  { %p4907_p4 = pnand %p4905_p3, %p4902_p2 }
  0x2c   :  { %4910 = shalt.err (!%p4907_p4)
}
  0x2d   :  { %s4911_s5 = scalar_lea.vmem %s92_s18, 16  ;;  %s4915_s28 = scalar_lea.vmem %s92_s18, 32 }
  0x2e   :  { %p4912_p5 = scmp.ne.s32.totalorder %s92_s18, %s4911_s5  ;;  %p4916_p6 = scmp.lt.s32.totalorder %s92_s18, %s92_s18 }
  0x2f   :  { %p4917_p7 = scmp.lt.s32.totalorder %s4915_s28, %s4911_s5 }
  0x31   :  { %p4918_p8 = por %p4917_p7, %p4916_p6 }
  0x33   :  { %p4919_p9 = pnand %p4918_p8, %p4912_p5 }
  0x35   :  { %4922 = shalt.err (!%p4919_p9)
}
  0x36   :  { %94 = dma.hbm_to_vmem [thread:$0]  %s5413_s8, 16, %s92_s18, [#allocation11]  }
  0x37   :  { %s4923_s17 = scalar_lea.hbm %s5415_s10, 16 }
  0x38   :  { %p4924_p10 = scmp.ne.s32.totalorder %s5415_s10, %s4923_s17  ;;  %p4927_p11 = scmp.lt.u32.totalorder %s4923_s17, %s5415_s10 }
  0x3a   :  { %p4929_p12 = pnand %p4927_p11, %p4924_p10 }
  0x3c   :  { %4932 = shalt.err (!%p4929_p12)
}
  0x3d   :  { %s4933_s24 = scalar_lea.vmem %s114_s20, 16  ;;  %s4937_s25 = scalar_lea.vmem %s114_s20, 32 }
  0x3e   :  { %p4934_p13 = scmp.ne.s32.totalorder %s114_s20, %s4933_s24  ;;  %p4938_p0 = scmp.lt.s32.totalorder %s114_s20, %s114_s20 }
  0x3f   :  { %p4939_p1 = scmp.lt.s32.totalorder %s4937_s25, %s4933_s24 }
  0x41   :  { %p4940_p2 = por %p4939_p1, %p4938_p0 }
  0x43   :  { %p4941_p3 = pnand %p4940_p2, %p4934_p13 }
  0x45   :  { %4944 = shalt.err (!%p4941_p3)
}
  0x46   :  { %116 = dma.hbm_to_vmem [thread:$0]  %s5415_s10, 16, %s114_s20, [#allocation14]  }
  0x47   :  { %s5071_s27 = smov [#allocation2]   ;;  %s4945_s30 = scalar_lea.hbm %s5406_s1, 16384 }
  0x48   :  { %s30_s29 = sshll.u32 %s5071_s27, 4  ;;  %p4946_p4 = scmp.ne.s32.totalorder %s5406_s1, %s4945_s30  ;;  %s31_s29 = int_to_ptr.vmem [resolvable:$true] %s30_s29 }
  0x49   :  { %p4949_p5 = scmp.lt.u32.totalorder %s4945_s30, %s5406_s1 }
  0x4b   :  { %p4951_p6 = pnand %p4949_p5, %p4946_p4 }
  0x4d   :  { %4954 = shalt.err (!%p4951_p6)
}
  0x4e   :  { %s4955_s19 = scalar_lea.vmem %s31_s29, 16384  ;;  %p4960_p8 = scmp.lt.s32.totalorder %s31_s29, %s31_s29 }
  0x4f   :  { %p4956_p7 = scmp.ne.s32.totalorder %s31_s29, %s4955_s19  ;;  %p4961_p9 = scmp.lt.s32.totalorder %s4955_s19, %s4955_s19 }
  0x51   :  { %p4962_p10 = por %p4961_p9, %p4960_p8 }
  0x53   :  { %p4963_p11 = pnand %p4962_p10, %p4956_p7 }
  0x55   :  { %4966 = shalt.err (!%p4963_p11)
}
  0x56   :  { %s5072_s10 = smov 512   ;;  %s5073_s20 = smov 32  }
  0x57   :  { %36 = dma.hbm_to_vmem [thread:$0]  %s5406_s1, 16384, %s31_s29, [#allocation3], %s5072_s10, %s5072_s10, %s5073_s20  }
  0x58   :  { %s5074_s23 = smov [#allocation6]   ;;  %s4967_s18 = scalar_lea.hbm %s5408_s3, 32768 }
  0x59   :  { %s52_s24 = sshll.u32 %s5074_s23, 4  ;;  %p4968_p12 = scmp.ne.s32.totalorder %s5408_s3, %s4967_s18  ;;  %s53_s24 = int_to_ptr.vmem [resolvable:$true] %s52_s24 }
  0x5a   :  { %p4971_p13 = scmp.lt.u32.totalorder %s4967_s18, %s5408_s3 }
  0x5c   :  { %p4973_p0 = pnand %p4971_p13, %p4968_p12 }
  0x5e   :  { %4976 = shalt.err (!%p4973_p0)
}
  0x5f   :  { %s4977_s14 = scalar_lea.vmem %s53_s24, 32768  ;;  %p4982_p2 = scmp.lt.s32.totalorder %s53_s24, %s53_s24 }
  0x60   :  { %p4978_p1 = scmp.ne.s32.totalorder %s53_s24, %s4977_s14  ;;  %p4983_p3 = scmp.lt.s32.totalorder %s4977_s14, %s4977_s14 }
  0x62   :  { %p4984_p4 = por %p4983_p3, %p4982_p2 }
  0x64   :  { %p4985_p5 = pnand %p4984_p4, %p4978_p1 }
  0x66   :  { %4988 = shalt.err (!%p4985_p5)
}
  0x67   :  { %s5075_s1 = smov 256   ;;  %s5076_s29 = smov 16  }
  0x68   :  { %58 = dma.hbm_to_vmem [thread:$0]  %s5408_s3, 32768, %s53_s24, [#allocation5], %s5075_s1, %s5075_s1, %s5076_s29  }
  0x69   :  { %s5077_s17 = smov [#allocation9]   ;;  %s5078_s10 = smov [#allocation12]  }
  0x6a   :  { %s79_s19 = sshll.u32 %s5077_s17, 4  ;;  %s100_s20 = sshll.u32 %s5078_s10, 4  ;;  %s80_s19 = int_to_ptr.vmem [resolvable:$true] %s79_s19  ;;  %s5237_s20 = int_to_ptr.vmem [resolvable:$true] %s100_s20 }
  0x6b   :  { %s4989_s23 = scalar_lea.hbm %s5411_s6, 16 }
  0x6c   :  { %p4990_p6 = scmp.ne.s32.totalorder %s5411_s6, %s4989_s23  ;;  %p4993_p7 = scmp.lt.u32.totalorder %s4989_s23, %s5411_s6 }
  0x6e   :  { %p4995_p8 = pnand %p4993_p7, %p4990_p6 }
  0x70   :  { %4998 = shalt.err (!%p4995_p8)
}
  0x71   :  { %s4999_s3 = scalar_lea.vmem %s80_s19, 16  ;;  %s5003_s24 = scalar_lea.vmem %s80_s19, 32 }
  0x72   :  { %p5000_p9 = scmp.ne.s32.totalorder %s80_s19, %s4999_s3  ;;  %p5004_p10 = scmp.lt.s32.totalorder %s80_s19, %s80_s19 }
  0x73   :  { %p5005_p11 = scmp.lt.s32.totalorder %s5003_s24, %s4999_s3 }
  0x75   :  { %p5006_p12 = por %p5005_p11, %p5004_p10 }
  0x77   :  { %p5007_p13 = pnand %p5006_p12, %p5000_p9 }
  0x79   :  { %5010 = shalt.err (!%p5007_p13)
}
  0x7a   :  { %82 = dma.hbm_to_vmem [thread:$0]  %s5411_s6, 16, %s80_s19, [#allocation8]  }
  0x7b   :  { %s5011_s1 = scalar_lea.hbm %s5414_s9, 1024 }
  0x7c   :  { %p5012_p0 = scmp.ne.s32.totalorder %s5414_s9, %s5011_s1  ;;  %p5015_p1 = scmp.lt.u32.totalorder %s5011_s1, %s5414_s9 }
  0x7e   :  { %p5017_p2 = pnand %p5015_p1, %p5012_p0 }
  0x80   :  { %5020 = shalt.err (!%p5017_p2)
}
  0x81   :  { %s5021_s10 = scalar_lea.vmem %s5237_s20, 1024  ;;  %p5026_p4 = scmp.lt.s32.totalorder %s5237_s20, %s5237_s20 }
  0x82   :  { %p5022_p3 = scmp.ne.s32.totalorder %s5237_s20, %s5021_s10  ;;  %p5027_p5 = scmp.lt.s32.totalorder %s5021_s10, %s5021_s10 }
  0x84   :  { %p5028_p6 = por %p5027_p5, %p5026_p4 }
  0x86   :  { %p5029_p7 = pnand %p5028_p6, %p5022_p3 }
  0x88   :  { %5032 = shalt.err (!%p5029_p7)
}
  0x89   :  { %106 = dma.hbm_to_vmem [thread:$0]  %s5414_s9, 1024, %s5237_s20, [#allocation11], %s5067_s2, %s5067_s2, %s5068_s26  }
  0x8a   :  { %s5079_s21 = smov [#allocation15]   ;;  %s5033_s8 = scalar_lea.hbm %s5416_s11, 2048 }
  0x8b   :  { %s122_s22 = sshll.u32 %s5079_s21, 4  ;;  %p5034_p8 = scmp.ne.s32.totalorder %s5416_s11, %s5033_s8  ;;  %s123_s22 = int_to_ptr.vmem [resolvable:$true] %s122_s22 }
  0x8c   :  { %p5037_p9 = scmp.lt.u32.totalorder %s5033_s8, %s5416_s11 }
  0x8e   :  { %p5039_p10 = pnand %p5037_p9, %p5034_p8 }
  0x90   :  { %5042 = shalt.err (!%p5039_p10)
}
  0x91   :  { %s5043_s5 = scalar_lea.vmem %s123_s22, 2048  ;;  %p5048_p12 = scmp.lt.s32.totalorder %s123_s22, %s123_s22 }
  0x92   :  { %p5044_p11 = scmp.ne.s32.totalorder %s123_s22, %s5043_s5  ;;  %p5049_p13 = scmp.lt.s32.totalorder %s5043_s5, %s5043_s5 }
  0x94   :  { %p5050_p0 = por %p5049_p13, %p5048_p12 }
  0x96   :  { %p5051_p1 = pnand %p5050_p0, %p5044_p11 }
  0x98   :  { %5054 = shalt.err (!%p5051_p1)
}
  0x99   :  { %s5080_s9 = smov 128   ;;  %s5081_s2 = smov 8  }
  0x9a   :  { %128 = dma.hbm_to_vmem [thread:$0]  %s5416_s11, 2048, %s123_s22, [#allocation14], %s5080_s9, %s5080_s9, %s5081_s2  }
  0x9b   :  { %5055 = dma.done.wait [#allocation3], 16384  }
  0x9c   :  { %5056 = vsyncadd [#allocation3], 4294950912 }
  0x9d   :  { %5057 = dma.done.wait [#allocation5], 32896  }
  0x9e   :  { %5058 = vsyncadd [#allocation5], 4294934400 }
  0x9f   :  { %5059 = dma.done.wait [#allocation8], 4112  }
  0xa0   :  { %5060 = vsyncadd [#allocation8], 4294963184 }
  0xa1   :  { %5061 = dma.done.wait [#allocation11], 1040  }
  0xa2   :  { %5062 = vsyncadd [#allocation11], 4294966256 }
  0xa3   :  { %5063 = dma.done.wait [#allocation14], 2064  }
  0xa4   :  { %5064 = vsyncadd [#allocation14], 4294965232  ;;  %v163_v0 = vld [vmem:[#allocation2] sm:$0xff]  ;;  %v164_v17 = vld [vmem:[#allocation2 + $0x8] sm:$0xff]  ;;  %vm5083_vm0 = vmmov 0  }
  0xa5   :  { %v167_v1 = vld [vmem:[#allocation2 + $0x20] sm:$0xff]  ;;  %v168_v18 = vld [vmem:[#allocation2 + $0x28] sm:$0xff] }
  0xa6   :  { %v171_v2 = vld [vmem:[#allocation2 + $0x40] sm:$0xff]  ;;  %v3791_v3 = vcombine.high %v163_v0, %v167_v1  ;;  %v3790_v4 = vcombine.low %v163_v0, %v167_v1  ;;  %v160_v19 = vld [vmem:[%s5405_s0 + $0x8] sm:$0xff]  ;;  %v3793_v21 = vcombine.high %v164_v17, %v168_v18  ;;  %v3792_v22 = vcombine.low %v164_v17, %v168_v18 }
  0xa7   :  { %v175_v5 = vld [vmem:[#allocation2 + $0x60] sm:$0xff]  ;;  %v5286_v23 = vpack.c.bf16 %v160_v19, %v160_v19  ;;  %v172_v24 = vld [vmem:[#allocation2 + $0x48] sm:$0xff] }
  0xa8   :  { %v3799_v6 = vcombine.high %v171_v2, %v175_v5  ;;  %v179_v7 = vld [vmem:[#allocation2 + $0x80] sm:$0xff]  ;;  %973 = vmatprep.subr.bf16.mxu0 %v3791_v3  ;;  %v3798_v9 = vcombine.low %v171_v2, %v175_v5  ;;  %v176_v25 = vld [vmem:[#allocation2 + $0x68] sm:$0xff]  ;;  %1014 = vmatprep.subr.bf16.mxu1 %v3793_v21 }
  0xa9   :  { %v183_v8 = vld [vmem:[#allocation2 + $0xa0] sm:$0xff]  ;;  %974 = vmatpush1.bf16.msra.mxu0 %v3790_v4  ;;  %v3801_v27 = vcombine.high %v172_v24, %v176_v25  ;;  %v180_v28 = vld [vmem:[#allocation2 + $0x88] sm:$0xff]  ;;  %1005 = vmatprep.mubr.bf16.mxu0 %v5286_v23  ;;  %v3800_v32 = vcombine.low %v172_v24, %v176_v25 }
  0xaa   :  { %975 = vmatprep.subr.bf16.mxu0 %v3799_v6  ;;  %v3807_v10 = vcombine.high %v179_v7, %v183_v8  ;;  %v187_v11 = vld [vmem:[#allocation2 + $0xc0] sm:$0xff]  ;;  %v3806_v13 = vcombine.low %v179_v7, %v183_v8  ;;  %v184_v29 = vld [vmem:[#allocation2 + $0xa8] sm:$0xff]  ;;  %1015 = vmatpush1.bf16.msra.mxu1 %v3792_v22 }
  0xab   :  { %v191_v12 = vld [vmem:[#allocation2 + $0xe0] sm:$0xff]  ;;  %1046 = vmatprep.mubr.bf16.mxu1 %v5286_v23  ;;  %1016 = vmatprep.subr.bf16.mxu1 %v3801_v27  ;;  %v3809_v34 = vcombine.high %v180_v28, %v184_v29  ;;  %v188_v36 = vld [vmem:[#allocation2 + $0xc8] sm:$0xff]  ;;  %v3808_v40 = vcombine.low %v180_v28, %v184_v29 }
  0xac   :  { %v3815_v14 = vcombine.high %v187_v11, %v191_v12  ;;  %v195_v15 = vld [vmem:[#allocation2 + $0x100] sm:$0xff]  ;;  %v3814_v20 = vcombine.low %v187_v11, %v191_v12  ;;  %v192_v37 = vld [vmem:[#allocation2 + $0xe8] sm:$0xff] }
  0xad   :  { %976 = vmatpush1.bf16.msra.mxu0 %v3798_v9  ;;  %v199_v16 = vld [vmem:[#allocation2 + $0x120] sm:$0xff]  ;;  %v3817_v42 = vcombine.high %v188_v36, %v192_v37  ;;  %v196_v44 = vld [vmem:[#allocation2 + $0x108] sm:$0xff]  ;;  %v3816_v48 = vcombine.low %v188_v36, %v192_v37 }
  0xae   :  { %977 = vmatprep.subr.bf16.mxu0 %v3807_v10  ;;  %v3823_v26 = vcombine.high %v195_v15, %v199_v16  ;;  %v203_v30 = vld [vmem:[#allocation2 + $0x140] sm:$0xff]  ;;  %v3822_v33 = vcombine.low %v195_v15, %v199_v16  ;;  %1017 = vmatpush1.bf16.msra.mxu1 %v3800_v32  ;;  %v200_v45 = vld [vmem:[#allocation2 + $0x128] sm:$0xff] }
  0xaf   :  { %v207_v31 = vld [vmem:[#allocation2 + $0x160] sm:$0xff]  ;;  %1018 = vmatprep.subr.bf16.mxu1 %v3809_v34  ;;  %v3825_v50 = vcombine.high %v196_v44, %v200_v45  ;;  %v204_v52 = vld [vmem:[#allocation2 + $0x148] sm:$0xff]  ;;  %v3824_v56 = vcombine.low %v196_v44, %v200_v45 }
  0xb0   :  { %v3831_v35 = vcombine.high %v203_v30, %v207_v31  ;;  %v211_v38 = vld [vmem:[#allocation2 + $0x180] sm:$0xff]  ;;  %v3830_v41 = vcombine.low %v203_v30, %v207_v31  ;;  %v208_v53 = vld [vmem:[#allocation2 + $0x168] sm:$0xff] }
  0xb1   :  { %978 = vmatpush1.bf16.msra.mxu0 %v3806_v13  ;;  %v215_v39 = vld [vmem:[#allocation2 + $0x1a0] sm:$0xff]  ;;  %v3833_v58 = vcombine.high %v204_v52, %v208_v53  ;;  %v212_v60 = vld [vmem:[#allocation2 + $0x188] sm:$0xff]  ;;  %v3832_v0 = vcombine.low %v204_v52, %v208_v53 }
  0xb2   :  { %979 = vmatprep.subr.bf16.mxu0 %v3815_v14  ;;  %v3839_v43 = vcombine.high %v211_v38, %v215_v39  ;;  %v219_v46 = vld [vmem:[#allocation2 + $0x1c0] sm:$0xff]  ;;  %1019 = vmatpush1.bf16.msra.mxu1 %v3808_v40  ;;  %v3838_v49 = vcombine.low %v211_v38, %v215_v39  ;;  %v216_v61 = vld [vmem:[#allocation2 + $0x1a8] sm:$0xff] }
  0xb3   :  { %v223_v47 = vld [vmem:[#allocation2 + $0x1e0] sm:$0xff]  ;;  %1020 = vmatprep.subr.bf16.mxu1 %v3817_v42  ;;  %v3841_v2 = vcombine.high %v212_v60, %v216_v61  ;;  %v220_v4 = vld [vmem:[#allocation2 + $0x1c8] sm:$0xff]  ;;  %v3840_v8 = vcombine.low %v212_v60, %v216_v61 }
  0xb4   :  { %v3847_v51 = vcombine.high %v219_v46, %v223_v47  ;;  %v227_v54 = vld [vmem:[#allocation2 + $0x200] sm:$0xff]  ;;  %v3846_v57 = vcombine.low %v219_v46, %v223_v47  ;;  %v224_v5 = vld [vmem:[#allocation2 + $0x1e8] sm:$0xff] }
  0xb5   :  { %980 = vmatpush1.bf16.msra.mxu0 %v3814_v20  ;;  %v231_v55 = vld [vmem:[#allocation2 + $0x220] sm:$0xff]  ;;  %v3849_v10 = vcombine.high %v220_v4, %v224_v5  ;;  %v228_v12 = vld [vmem:[#allocation2 + $0x208] sm:$0xff]  ;;  %v3848_v16 = vcombine.low %v220_v4, %v224_v5 }
  0xb6   :  { %981 = vmatprep.subr.bf16.mxu0 %v3823_v26  ;;  %1021 = vmatpush1.bf16.msra.mxu1 %v3816_v48  ;;  %v3855_v59 = vcombine.high %v227_v54, %v231_v55  ;;  %v235_v62 = vld [vmem:[#allocation2 + $0x240] sm:$0xff]  ;;  %v3854_v1 = vcombine.low %v227_v54, %v231_v55  ;;  %v232_v13 = vld [vmem:[#allocation2 + $0x228] sm:$0xff]  ;;  %v165_v55 = vld [vmem:[#allocation2 + $0x10] sm:$0xff] }
  0xb7   :  { %1022 = vmatprep.subr.bf16.mxu1 %v3825_v50  ;;  %v239_v63 = vld [vmem:[#allocation2 + $0x260] sm:$0xff]  ;;  %v3857_v18 = vcombine.high %v228_v12, %v232_v13  ;;  %v236_v20 = vld [vmem:[#allocation2 + $0x248] sm:$0xff]  ;;  %v3856_v25 = vcombine.low %v228_v12, %v232_v13 }
  0xb8   :  { %v3863_v3 = vcombine.high %v235_v62, %v239_v63  ;;  %v243_v6 = vld [vmem:[#allocation2 + $0x280] sm:$0xff]  ;;  %v3862_v9 = vcombine.low %v235_v62, %v239_v63  ;;  %v240_v21 = vld [vmem:[#allocation2 + $0x268] sm:$0xff] }
  0xb9   :  { %982 = vmatpush1.bf16.msra.mxu0 %v3822_v33  ;;  %v247_v7 = vld [vmem:[#allocation2 + $0x2a0] sm:$0xff]  ;;  %v3865_v28 = vcombine.high %v236_v20, %v240_v21  ;;  %v244_v30 = vld [vmem:[#allocation2 + $0x288] sm:$0xff]  ;;  %v3864_v33 = vcombine.low %v236_v20, %v240_v21  ;;  %v197_v21 = vld [vmem:[#allocation2 + $0x110] sm:$0xff] }
  0xba   :  { %983 = vmatprep.subr.bf16.mxu0 %v3831_v35  ;;  %1023 = vmatpush1.bf16.msra.mxu1 %v3824_v56  ;;  %v3871_v11 = vcombine.high %v243_v6, %v247_v7  ;;  %v251_v14 = vld [vmem:[#allocation2 + $0x2c0] sm:$0xff]  ;;  %v3870_v17 = vcombine.low %v243_v6, %v247_v7  ;;  %v248_v31 = vld [vmem:[#allocation2 + $0x2a8] sm:$0xff]  ;;  %v169_v56 = vld [vmem:[#allocation2 + $0x30] sm:$0xff] }
  0xbb   :  { %1024 = vmatprep.subr.bf16.mxu1 %v3833_v58  ;;  %v255_v15 = vld [vmem:[#allocation2 + $0x2e0] sm:$0xff]  ;;  %v3873_v36 = vcombine.high %v244_v30, %v248_v31  ;;  %v252_v38 = vld [vmem:[#allocation2 + $0x2c8] sm:$0xff]  ;;  %v3795_v63 = vcombine.high %v165_v55, %v169_v56  ;;  %v3794_v6 = vcombine.low %v165_v55, %v169_v56  ;;  %v229_v55 = vld [vmem:[#allocation2 + $0x210] sm:$0xff] }
  0xbc   :  { %v3879_v19 = vcombine.high %v251_v14, %v255_v15  ;;  %v259_v22 = vld [vmem:[#allocation2 + $0x300] sm:$0xff]  ;;  %v3878_v26 = vcombine.low %v251_v14, %v255_v15  ;;  %v256_v39 = vld [vmem:[#allocation2 + $0x2e8] sm:$0xff]  ;;  %v189_v14 = vld [vmem:[#allocation2 + $0xd0] sm:$0xff] }
  0xbd   :  { %984 = vmatpush1.bf16.msra.mxu0 %v3830_v41  ;;  %v263_v24 = vld [vmem:[#allocation2 + $0x320] sm:$0xff]  ;;  %v3872_v41 = vcombine.low %v244_v30, %v248_v31  ;;  %v3881_v44 = vcombine.high %v252_v38, %v256_v39  ;;  %v260_v46 = vld [vmem:[#allocation2 + $0x308] sm:$0xff]  ;;  %v205_v30 = vld [vmem:[#allocation2 + $0x150] sm:$0xff] }
  0xbe   :  { %985 = vmatprep.subr.bf16.mxu0 %v3839_v43  ;;  %1025 = vmatpush1.bf16.msra.mxu1 %v3832_v0  ;;  %v267_v27 = vld [vmem:[#allocation2 + $0x340] sm:$0xff]  ;;  %v3887_v29 = vcombine.high %v259_v22, %v263_v24  ;;  %v3886_v34 = vcombine.low %v259_v22, %v263_v24  ;;  %v264_v47 = vld [vmem:[#allocation2 + $0x328] sm:$0xff]  ;;  %v173_v0 = vld [vmem:[#allocation2 + $0x50] sm:$0xff] }
  0xbf   :  { %1026 = vmatprep.subr.bf16.mxu1 %v3841_v2  ;;  %v271_v32 = vld [vmem:[#allocation2 + $0x360] sm:$0xff]  ;;  %v268_v52 = vld [vmem:[#allocation2 + $0x348] sm:$0xff]  ;;  %v233_v56 = vld [vmem:[#allocation2 + $0x230] sm:$0xff] }
  0xc0   :  { %v275_v35 = vld [vmem:[#allocation2 + $0x380] sm:$0xff]  ;;  %v3895_v37 = vcombine.high %v267_v27, %v271_v32  ;;  %v3894_v42 = vcombine.low %v267_v27, %v271_v32  ;;  %v272_v54 = vld [vmem:[#allocation2 + $0x368] sm:$0xff]  ;;  %v201_v27 = vld [vmem:[#allocation2 + $0x130] sm:$0xff] }
  0xc1   :  { %986 = vmatpush1.bf16.msra.mxu0 %v3838_v49  ;;  %v279_v40 = vld [vmem:[#allocation2 + $0x3a0] sm:$0xff]  ;;  %v3880_v49 = vcombine.low %v252_v38, %v256_v39  ;;  %v3897_v60 = vcombine.high %v268_v52, %v272_v54  ;;  %v276_v61 = vld [vmem:[#allocation2 + $0x388] sm:$0xff]  ;;  %v3827_v32 = vcombine.high %v197_v21, %v201_v27  ;;  %v213_v38 = vld [vmem:[#allocation2 + $0x190] sm:$0xff] }
  0xc2   :  { %987 = vmatprep.subr.bf16.mxu0 %v3847_v51  ;;  %1027 = vmatpush1.bf16.msra.mxu1 %v3840_v8  ;;  %v283_v43 = vld [vmem:[#allocation2 + $0x3c0] sm:$0xff]  ;;  %v3903_v45 = vcombine.high %v275_v35, %v279_v40  ;;  %v3902_v50 = vcombine.low %v275_v35, %v279_v40  ;;  %v3889_v51 = vcombine.high %v260_v46, %v264_v47  ;;  %v280_v62 = vld [vmem:[#allocation2 + $0x3a8] sm:$0xff]  ;;  %v209_v35 = vld [vmem:[#allocation2 + $0x170] sm:$0xff] }
  0xc3   :  { %1028 = vmatprep.subr.bf16.mxu1 %v3849_v10  ;;  %v287_v48 = vld [vmem:[#allocation2 + $0x3e0] sm:$0xff]  ;;  %v3905_v4 = vcombine.high %v276_v61, %v280_v62  ;;  %v284_v5 = vld [vmem:[#allocation2 + $0x3c8] sm:$0xff]  ;;  %v185_v10 = vld [vmem:[#allocation2 + $0xb0] sm:$0xff] }
  0xc4   :  { %v3911_v53 = vcombine.high %v283_v43, %v287_v48  ;;  %v3910_v58 = vcombine.low %v283_v43, %v287_v48  ;;  %v288_v7 = vld [vmem:[#allocation2 + $0x3e8] sm:$0xff]  ;;  %v217_v39 = vld [vmem:[#allocation2 + $0x1b0] sm:$0xff]  ;;  %v3835_v43 = vcombine.high %v205_v30, %v209_v35 }
  0xc5   :  { %988 = vmatpush1.bf16.msra.mxu0 %v3846_v57  ;;  %v3888_v57 = vcombine.low %v260_v46, %v264_v47  ;;  %v3913_v12 = vcombine.high %v284_v5, %v288_v7  ;;  %v202_v46 = vld [vmem:[#allocation2 + $0x138] sm:$0xff]  ;;  %v3834_v47 = vcombine.low %v205_v30, %v209_v35  ;;  %v221_v48 = vld [vmem:[#allocation2 + $0x1d0] sm:$0xff] }
  0xc6   :  { %989 = vmatprep.subr.bf16.mxu0 %v3855_v59  ;;  %1029 = vmatpush1.bf16.msra.mxu1 %v3848_v16  ;;  %v159_v59 = vld [vmem:[%s5405_s0] sm:$0xff]  ;;  %v166_v16 = vld [vmem:[#allocation2 + $0x18] sm:$0xff] }
  0xc7   :  { %1030 = vmatprep.subr.bf16.mxu1 %v3857_v18  ;;  %v5293_v2 = vpack.c.bf16 %v159_v59, %v159_v59  ;;  %v193_v18 = vld [vmem:[#allocation2 + $0xf0] sm:$0xff]  ;;  %v246_v30 = vld [vmem:[#allocation2 + $0x298] sm:$0xff] }
  0xc8   :  { %v3819_v24 = vcombine.high %v189_v14, %v193_v18 }
  0xc9   :  { %990 = vmatpush1.bf16.msra.mxu0 %v3854_v1  ;;  %v177_v1 = vld [vmem:[#allocation2 + $0x70] sm:$0xff] }
  0xca   :  { %991 = vmatprep.subr.bf16.mxu0 %v3863_v3  ;;  %1031 = vmatpush1.bf16.msra.mxu1 %v3856_v25  ;;  %v3896_v3 = vcombine.low %v268_v52, %v272_v54  ;;  %v3803_v8 = vcombine.high %v173_v0, %v177_v1  ;;  %v3802_v13 = vcombine.low %v173_v0, %v177_v1  ;;  %v174_v25 = vld [vmem:[#allocation2 + $0x58] sm:$0xff]  ;;  %v241_v0 = vld [vmem:[#allocation2 + $0x270] sm:$0xff] }
  0xcb   :  { %1032 = vmatprep.subr.bf16.mxu1 %v3865_v28  ;;  %v206_v52 = vld [vmem:[#allocation2 + $0x158] sm:$0xff]  ;;  %v3842_v54 = vcombine.low %v213_v38, %v217_v39 }
  0xcd   :  { %992 = vmatpush1.bf16.msra.mxu0 %v3862_v9  ;;  %v181_v9 = vld [vmem:[#allocation2 + $0x90] sm:$0xff] }
  0xce   :  { %993 = vmatprep.subr.bf16.mxu0 %v3871_v11  ;;  %1033 = vmatpush1.bf16.msra.mxu1 %v3864_v33  ;;  %v3904_v11 = vcombine.low %v276_v61, %v280_v62  ;;  %v3811_v15 = vcombine.high %v181_v9, %v185_v10  ;;  %v3810_v20 = vcombine.low %v181_v9, %v185_v10  ;;  %v182_v33 = vld [vmem:[#allocation2 + $0x98] sm:$0xff]  ;;  %v249_v9 = vld [vmem:[#allocation2 + $0x2b0] sm:$0xff] }
  0xcf   :  { %1034 = vmatprep.subr.bf16.mxu1 %v3873_v36  ;;  %v218_v61 = vld [vmem:[#allocation2 + $0x1b8] sm:$0xff] }
  0xd1   :  { %994 = vmatpush1.bf16.msra.mxu0 %v3870_v17  ;;  %v170_v17 = vld [vmem:[#allocation2 + $0x38] sm:$0xff] }
  0xd2   :  { %995 = vmatprep.subr.bf16.mxu0 %v3879_v19  ;;  %1035 = vmatpush1.bf16.msra.mxu1 %v3872_v41  ;;  %v3912_v19 = vcombine.low %v284_v5, %v288_v7  ;;  %v3797_v22 = vcombine.high %v166_v16, %v170_v17  ;;  %v3796_v28 = vcombine.low %v166_v16, %v170_v17  ;;  %v190_v41 = vld [vmem:[#allocation2 + $0xd8] sm:$0xff]  ;;  %v253_v16 = vld [vmem:[#allocation2 + $0x2d0] sm:$0xff] }
  0xd3   :  { %1036 = vmatprep.subr.bf16.mxu1 %v3881_v44  ;;  %v222_v5 = vld [vmem:[#allocation2 + $0x1d8] sm:$0xff]  ;;  %v3858_v7 = vcombine.low %v229_v55, %v233_v56  ;;  %v257_v17 = vld [vmem:[#allocation2 + $0x2f0] sm:$0xff] }
  0xd5   :  { %996 = vmatpush1.bf16.msra.mxu0 %v3878_v26  ;;  %v178_v26 = vld [vmem:[#allocation2 + $0x78] sm:$0xff] }
  0xd6   :  { %997 = vmatprep.subr.bf16.mxu0 %v3887_v29  ;;  %1037 = vmatpush1.bf16.msra.mxu1 %v3880_v49  ;;  %v3818_v29 = vcombine.low %v189_v14, %v193_v18  ;;  %v3805_v31 = vcombine.high %v174_v25, %v178_v26  ;;  %v3804_v36 = vcombine.low %v174_v25, %v178_v26  ;;  %v225_v49 = vld [vmem:[#allocation2 + $0x1f0] sm:$0xff]  ;;  %v234_v14 = vld [vmem:[#allocation2 + $0x238] sm:$0xff] }
  0xd7   :  { %1038 = vmatprep.subr.bf16.mxu1 %v3889_v51  ;;  %v3850_v62 = vcombine.low %v221_v48, %v225_v49  ;;  %v261_v25 = vld [vmem:[#allocation2 + $0x310] sm:$0xff] }
  0xd8   :  { %v265_v26 = vld [vmem:[#allocation2 + $0x330] sm:$0xff] }
  0xd9   :  { %998 = vmatpush1.bf16.msra.mxu0 %v3886_v34  ;;  %v186_v34 = vld [vmem:[#allocation2 + $0xb8] sm:$0xff] }
  0xda   :  { %999 = vmatprep.subr.bf16.mxu0 %v3895_v37  ;;  %1039 = vmatpush1.bf16.msra.mxu1 %v3888_v57  ;;  %v3826_v37 = vcombine.low %v197_v21, %v201_v27  ;;  %v3813_v40 = vcombine.high %v182_v33, %v186_v34  ;;  %v3812_v44 = vcombine.low %v182_v33, %v186_v34  ;;  %v238_v21 = vld [vmem:[#allocation2 + $0x258] sm:$0xff]  ;;  %v269_v33 = vld [vmem:[#allocation2 + $0x350] sm:$0xff] }
  0xdb   :  { %1040 = vmatprep.subr.bf16.mxu1 %v3897_v60  ;;  %v214_v60 = vld [vmem:[#allocation2 + $0x198] sm:$0xff]  ;;  %v273_v34 = vld [vmem:[#allocation2 + $0x370] sm:$0xff] }
  0xdc   :  { %v3845_v10 = vcombine.high %v214_v60, %v218_v61 }
  0xdd   :  { %1000 = vmatpush1.bf16.msra.mxu0 %v3894_v42  ;;  %v194_v42 = vld [vmem:[#allocation2 + $0xf8] sm:$0xff] }
  0xde   :  { %1001 = vmatprep.subr.bf16.mxu0 %v3903_v45  ;;  %1041 = vmatpush1.bf16.msra.mxu1 %v3896_v3  ;;  %v198_v45 = vld [vmem:[#allocation2 + $0x118] sm:$0xff]  ;;  %v3820_v51 = vcombine.low %v190_v41, %v194_v42  ;;  %v3859_v3 = vcombine.high %v229_v55, %v233_v56 }
  0xdf   :  { %1042 = vmatprep.subr.bf16.mxu1 %v3905_v4  ;;  %v3829_v57 = vcombine.high %v198_v45, %v202_v46  ;;  %v3828_v59 = vcombine.low %v198_v45, %v202_v46  ;;  %v262_v46 = vld [vmem:[#allocation2 + $0x318] sm:$0xff] }
  0xe1   :  { %1002 = vmatpush1.bf16.msra.mxu0 %v3902_v50  ;;  %v3843_v50 = vcombine.high %v213_v38, %v217_v39  ;;  %v254_v38 = vld [vmem:[#allocation2 + $0x2d8] sm:$0xff] }
  0xe2   :  { %1003 = vmatprep.subr.bf16.mxu0 %v3911_v53  ;;  %1043 = vmatpush1.bf16.msra.mxu1 %v3904_v11  ;;  %v210_v53 = vld [vmem:[#allocation2 + $0x178] sm:$0xff] }
  0xe3   :  { %1044 = vmatprep.subr.bf16.mxu1 %v3913_v12  ;;  %v3837_v1 = vcombine.high %v206_v52, %v210_v53  ;;  %v3836_v4 = vcombine.low %v206_v52, %v210_v53  ;;  %v3844_v12 = vcombine.low %v214_v60, %v218_v61  ;;  %v258_v39 = vld [vmem:[#allocation2 + $0x2f8] sm:$0xff] }
  0xe4   :  { %v3884_v52 = vcombine.low %v254_v38, %v258_v39  ;;  %v270_v53 = vld [vmem:[#allocation2 + $0x358] sm:$0xff] }
  0xe5   :  { %1004 = vmatpush1.bf16.msra.mxu0 %v3910_v58  ;;  %v3851_v58 = vcombine.high %v221_v48, %v225_v49  ;;  %v3898_v48 = vcombine.low %v269_v33, %v273_v34  ;;  %v285_v49 = vld [vmem:[#allocation2 + $0x3d0] sm:$0xff]  ;;  %v282_v60 = vld [vmem:[#allocation2 + $0x3b8] sm:$0xff] }
  0xe6   :  { %1055 = vmatprep.subr.bf16.mxu0 %v3795_v63  ;;  %1045 = vmatpush1.bf16.msra.mxu1 %v3912_v19  ;;  %v237_v63 = vld [vmem:[#allocation2 + $0x250] sm:$0xff]  ;;  %v4395_v61 = vld [vmem:[#allocation6 + $0x4] ss:$16 sps:$4 sm:$0xff]  }
  0xe7   :  { %1096 = vmatprep.subr.bf16.mxu1 %v3797_v22  ;;  %v3867_v11 = vcombine.high %v237_v63, %v241_v0  ;;  %v242_v22 = vld [vmem:[#allocation2 + $0x278] sm:$0xff] }
  0xe8   :  { %1006 = vmatmul.mubr.bf16.vlgmr.msra.gmra.mrb[0].mxu0 %v5293_v2  ;;  %v3869_v35 = vcombine.high %v238_v21, %v242_v22 }
  0xe9   :  { %1056 = vmatpush1.bf16.msra.mxu0 %v3794_v6  ;;  %1087 = vmatprep.mubr.bf16.mxu0 %v5286_v23  ;;  %v226_v6 = vld [vmem:[#allocation2 + $0x1f8] sm:$0xff] }
  0xea   :  { %1057 = vmatprep.subr.bf16.mxu0 %v3803_v8  ;;  %1047 = vmatmul.mubr.bf16.vlgmr.msra.gmra.mrb[0].mxu1 %v5293_v2  ;;  %v245_v8 = vld [vmem:[#allocation2 + $0x290] sm:$0xff]  ;;  %v3853_v18 = vcombine.high %v222_v5, %v226_v6 }
  0xeb   :  { %1097 = vmatpush1.bf16.msra.mxu1 %v3796_v28  ;;  %1128 = vmatprep.mubr.bf16.mxu1 %v5286_v23  ;;  %v3821_v23 = vcombine.high %v190_v41, %v194_v42  ;;  %v3875_v19 = vcombine.high %v245_v8, %v249_v9  ;;  %v3883_v28 = vcombine.high %v253_v16, %v257_v17  ;;  %v277_v41 = vld [vmem:[#allocation2 + $0x390] sm:$0xff] }
  0xec   :  { %1098 = vmatprep.subr.bf16.mxu1 %v3805_v31  ;;  %v250_v31 = vld [vmem:[#allocation2 + $0x2b8] sm:$0xff]  ;;  %v281_v42 = vld [vmem:[#allocation2 + $0x3b0] sm:$0xff] }
  0xed   :  { %1058 = vmatpush1.bf16.msra.mxu0 %v3802_v13  ;;  %v230_v13 = vld [vmem:[#allocation2 + $0x218] sm:$0xff]  ;;  %v3876_v45 = vcombine.low %v246_v30, %v250_v31  ;;  %v3906_v55 = vcombine.low %v277_v41, %v281_v42 }
  0xee   :  { %1059 = vmatprep.subr.bf16.mxu0 %v3811_v15  ;;  %v3866_v15 = vcombine.low %v237_v63, %v241_v0  ;;  %v3861_v27 = vcombine.high %v230_v13, %v234_v14  ;;  %v4393_v0 = vld [vmem:[#allocation6] ss:$16 sps:$4 sm:$0xff]  }
  0xef   :  { %1099 = vmatpush1.bf16.msra.mxu1 %v3804_v36  ;;  %v3891_v36 = vcombine.high %v261_v25, %v265_v26 }
  0xf0   :  { %1100 = vmatprep.subr.bf16.mxu1 %v3813_v40  ;;  %v3890_v40 = vcombine.low %v261_v25, %v265_v26  ;;  %v4416_v25 = vld [vmem:[#allocation6 + $0x6c] ss:$16 sps:$4 sm:$0xff]   ;;  %v4423_v26 = vld [vmem:[#allocation6 + $0xa0] ss:$16 sps:$4 sm:$0xff]  }
  0xf1   :  { %1060 = vmatpush1.bf16.msra.mxu0 %v3810_v20  ;;  %v3852_v20 = vcombine.low %v222_v5, %v226_v6  ;;  %v4401_v5 = vld [vmem:[#allocation6 + $0x24] ss:$16 sps:$4 sm:$0xff]  }
  0xf2   :  { %1061 = vmatprep.subr.bf16.mxu0 %v3819_v24  ;;  %v3874_v24 = vcombine.low %v245_v8, %v249_v9  ;;  %v4407_v9 = vld [vmem:[#allocation6 + $0x44] ss:$16 sps:$4 sm:$0xff]  }
  0xf3   :  { %1101 = vmatpush1.bf16.msra.mxu1 %v3812_v44  ;;  %v3899_v44 = vcombine.high %v269_v33, %v273_v34  ;;  %v4435_v33 = vld [vmem:[#allocation6 + $0xe0] ss:$16 sps:$4 sm:$0xff]   ;;  %v4426_v34 = vld [vmem:[#allocation6 + $0xa8] ss:$16 sps:$4 sm:$0xff]  }
  0xf4   :  { %1102 = vmatprep.subr.bf16.mxu1 %v3821_v23  ;;  %v289_v23 = vld [vmem:[#allocation2 + $0x3f0] sm:$0xff] }
  0xf5   :  { %1062 = vmatpush1.bf16.msra.mxu0 %v3818_v29  ;;  %v3860_v29 = vcombine.low %v230_v13, %v234_v14  ;;  %v4413_v14 = vld [vmem:[#allocation6 + $0x64] ss:$16 sps:$4 sm:$0xff]  }
  0xf6   :  { %1063 = vmatprep.subr.bf16.mxu0 %v3827_v32  ;;  %v3882_v32 = vcombine.low %v253_v16, %v257_v17  ;;  %v4404_v16 = vld [vmem:[#allocation6 + $0x2c] ss:$16 sps:$4 sm:$0xff]   ;;  %v4411_v17 = vld [vmem:[#allocation6 + $0x60] ss:$16 sps:$4 sm:$0xff]  }
  0xf7   :  { %1103 = vmatpush1.bf16.msra.mxu1 %v3820_v51  ;;  %v3907_v51 = vcombine.high %v277_v41, %v281_v42  ;;  %v4447_v41 = vld [vmem:[#allocation6 + $0x120] ss:$16 sps:$4 sm:$0xff]   ;;  %v4438_v42 = vld [vmem:[#allocation6 + $0xe8] ss:$16 sps:$4 sm:$0xff]  }
  0xf8   :  { %1104 = vmatprep.subr.bf16.mxu1 %v3829_v57  ;;  %v3915_v57 = vcombine.high %v285_v49, %v289_v23 }
  0xf9   :  { %1064 = vmatpush1.bf16.msra.mxu0 %v3826_v37  ;;  %v3868_v37 = vcombine.low %v238_v21, %v242_v22  ;;  %v4417_v21 = vld [vmem:[#allocation6 + $0x80] ss:$16 sps:$4 sm:$0xff]   ;;  %v4425_v22 = vld [vmem:[#allocation6 + $0xa4] ss:$16 sps:$4 sm:$0xff]  }
  0xfa   :  { %1065 = vmatprep.subr.bf16.mxu0 %v3835_v43  ;;  %v3877_v43 = vcombine.high %v246_v30, %v250_v31  ;;  %v4420_v30 = vld [vmem:[#allocation6 + $0x88] ss:$16 sps:$4 sm:$0xff]   ;;  %v4437_v31 = vld [vmem:[#allocation6 + $0xe4] ss:$16 sps:$4 sm:$0xff]  }
  0xfb   :  { %1105 = vmatpush1.bf16.msra.mxu1 %v3828_v59  ;;  %v278_v59 = vld [vmem:[#allocation2 + $0x398] sm:$0xff] }
  0xfc   :  { %1106 = vmatprep.subr.bf16.mxu1 %v3837_v1  ;;  %v3909_v6 = vcombine.high %v278_v59, %v282_v60  ;;  %v3908_v8 = vcombine.low %v278_v59, %v282_v60  ;;  %v4470_v59 = vld [vmem:[#allocation6 + $0x18c] ss:$16 sps:$4 sm:$0xff]   ;;  %v4477_v60 = vld [vmem:[#allocation6 + $0x1c0] ss:$16 sps:$4 sm:$0xff]  }
  0xfd   :  { %1066 = vmatpush1.bf16.msra.mxu0 %v3834_v47  ;;  %v266_v47 = vld [vmem:[#allocation2 + $0x338] sm:$0xff] }
  0xfe   :  { %1067 = vmatprep.subr.bf16.mxu0 %v3843_v50  ;;  %v3885_v50 = vcombine.high %v254_v38, %v258_v39  ;;  %v3893_v56 = vcombine.high %v262_v46, %v266_v47  ;;  %v4432_v38 = vld [vmem:[#allocation6 + $0xc8] ss:$16 sps:$4 sm:$0xff]   ;;  %v4449_v39 = vld [vmem:[#allocation6 + $0x124] ss:$16 sps:$4 sm:$0xff]  }
  0xff   :  { %1107 = vmatpush1.bf16.msra.mxu1 %v3836_v4  ;;  %v290_v4 = vld [vmem:[#allocation2 + $0x3f8] sm:$0xff] }
 0x100   :  { %1108 = vmatprep.subr.bf16.mxu1 %v3845_v10 }
 0x101   :  { %1068 = vmatpush1.bf16.msra.mxu0 %v3842_v54  ;;  %v274_v54 = vld [vmem:[#allocation2 + $0x378] sm:$0xff] }
 0x102   :  { %1069 = vmatprep.subr.bf16.mxu0 %v3851_v58  ;;  %v3892_v58 = vcombine.low %v262_v46, %v266_v47  ;;  %v3901_v63 = vcombine.high %v270_v53, %v274_v54  ;;  %v3900_v1 = vcombine.low %v270_v53, %v274_v54  ;;  %v4444_v46 = vld [vmem:[#allocation6 + $0x108] ss:$16 sps:$4 sm:$0xff]   ;;  %v4461_v47 = vld [vmem:[#allocation6 + $0x164] ss:$16 sps:$4 sm:$0xff]  }
 0x103   :  { %1109 = vmatpush1.bf16.msra.mxu1 %v3844_v12  ;;  %v4405_v12 = vld [vmem:[#allocation6 + $0x40] ss:$16 sps:$4 sm:$0xff]   ;;  %v4456_v53 = vld [vmem:[#allocation6 + $0x148] ss:$16 sps:$4 sm:$0xff]   ;;  %v4473_v54 = vld [vmem:[#allocation6 + $0x1a4] ss:$16 sps:$4 sm:$0xff]  }
 0x104   :  { %1110 = vmatprep.subr.bf16.mxu1 %v3853_v18  ;;  %v4419_v18 = vld [vmem:[#allocation6 + $0x84] ss:$16 sps:$4 sm:$0xff]  }
 0x105   :  { %1070 = vmatpush1.bf16.msra.mxu0 %v3850_v62  ;;  %v3914_v62 = vcombine.low %v285_v49, %v289_v23  ;;  %v4459_v49 = vld [vmem:[#allocation6 + $0x160] ss:$16 sps:$4 sm:$0xff]   ;;  %v4450_v23 = vld [vmem:[#allocation6 + $0x128] ss:$16 sps:$4 sm:$0xff]  }
 0x106   :  { %1071 = vmatprep.subr.bf16.mxu0 %v3859_v3  ;;  %v286_v3 = vld [vmem:[#allocation2 + $0x3d8] sm:$0xff] }
 0x107   :  { %1111 = vmatpush1.bf16.msra.mxu1 %v3852_v20  ;;  %v3917_v10 = vcombine.high %v286_v3, %v290_v4  ;;  %v3916_v13 = vcombine.low %v286_v3, %v290_v4  ;;  %v4410_v20 = vld [vmem:[#allocation6 + $0x4c] ss:$16 sps:$4 sm:$0xff]   ;;  %v4491_v3 = vld [vmem:[#allocation6 + $0x204] ss:$16 sps:$4 sm:$0xff]  }
 0x108   :  { %1112 = vmatprep.subr.bf16.mxu1 %v3861_v27  ;;  %v4414_v27 = vld [vmem:[#allocation6 + $0x68] ss:$16 sps:$4 sm:$0xff]   ;;  %v4482_v4 = vld [vmem:[#allocation6 + $0x1cc] ss:$16 sps:$4 sm:$0xff]  }
 0x109   :  { %1072 = vmatpush1.bf16.msra.mxu0 %v3858_v7  ;;  %v4399_v7 = vld [vmem:[#allocation6 + $0x20] ss:$16 sps:$4 sm:$0xff]  }
 0x10a   :  { %1073 = vmatprep.subr.bf16.mxu0 %v3867_v11  ;;  %v4398_v11 = vld [vmem:[#allocation6 + $0xc] ss:$16 sps:$4 sm:$0xff]  }
 0x10b   :  { %1113 = vmatpush1.bf16.msra.mxu1 %v3860_v29  ;;  %v4422_v29 = vld [vmem:[#allocation6 + $0x8c] ss:$16 sps:$4 sm:$0xff]  }
 0x10c   :  { %1114 = vmatprep.subr.bf16.mxu1 %v3869_v35  ;;  %v4443_v35 = vld [vmem:[#allocation6 + $0x104] ss:$16 sps:$4 sm:$0xff]  }
 0x10d   :  { %1074 = vmatpush1.bf16.msra.mxu0 %v3866_v15  ;;  %v4396_v15 = vld [vmem:[#allocation6 + $0x8] ss:$16 sps:$4 sm:$0xff]  }
 0x10e   :  { %1075 = vmatprep.subr.bf16.mxu0 %v3875_v19  ;;  %v4402_v19 = vld [vmem:[#allocation6 + $0x28] ss:$16 sps:$4 sm:$0xff]  }
 0x10f   :  { %1115 = vmatpush1.bf16.msra.mxu1 %v3868_v37  ;;  %v4441_v37 = vld [vmem:[#allocation6 + $0x100] ss:$16 sps:$4 sm:$0xff]  }
 0x110   :  { %1116 = vmatprep.subr.bf16.mxu1 %v3877_v43  ;;  %v4455_v43 = vld [vmem:[#allocation6 + $0x144] ss:$16 sps:$4 sm:$0xff]  }
 0x111   :  { %1076 = vmatpush1.bf16.msra.mxu0 %v3874_v24  ;;  %v4408_v24 = vld [vmem:[#allocation6 + $0x48] ss:$16 sps:$4 sm:$0xff]  }
 0x112   :  { %1077 = vmatprep.subr.bf16.mxu0 %v3883_v28  ;;  %v4431_v28 = vld [vmem:[#allocation6 + $0xc4] ss:$16 sps:$4 sm:$0xff]  }
 0x113   :  { %1117 = vmatpush1.bf16.msra.mxu1 %v3876_v45  ;;  %v4453_v45 = vld [vmem:[#allocation6 + $0x140] ss:$16 sps:$4 sm:$0xff]  }
 0x114   :  { %1118 = vmatprep.subr.bf16.mxu1 %v3885_v50  ;;  %v4467_v50 = vld [vmem:[#allocation6 + $0x184] ss:$16 sps:$4 sm:$0xff]  }
 0x115   :  { %1078 = vmatpush1.bf16.msra.mxu0 %v3882_v32  ;;  %v4428_v32 = vld [vmem:[#allocation6 + $0xac] ss:$16 sps:$4 sm:$0xff]  }
 0x116   :  { %1079 = vmatprep.subr.bf16.mxu0 %v3891_v36  ;;  %v4434_v36 = vld [vmem:[#allocation6 + $0xcc] ss:$16 sps:$4 sm:$0xff]  }
 0x117   :  { %1119 = vmatpush1.bf16.msra.mxu1 %v3884_v52  ;;  %v4465_v52 = vld [vmem:[#allocation6 + $0x180] ss:$16 sps:$4 sm:$0xff]  }
 0x118   :  { %1120 = vmatprep.subr.bf16.mxu1 %v3893_v56  ;;  %v4471_v56 = vld [vmem:[#allocation6 + $0x1a0] ss:$16 sps:$4 sm:$0xff]  }
 0x119   :  { %1080 = vmatpush1.bf16.msra.mxu0 %v3890_v40  ;;  %v4440_v40 = vld [vmem:[#allocation6 + $0xec] ss:$16 sps:$4 sm:$0xff]  }
 0x11a   :  { %1081 = vmatprep.subr.bf16.mxu0 %v3899_v44  ;;  %v4446_v44 = vld [vmem:[#allocation6 + $0x10c] ss:$16 sps:$4 sm:$0xff]  }
 0x11b   :  { %1121 = vmatpush1.bf16.msra.mxu1 %v3892_v58  ;;  %v4479_v58 = vld [vmem:[#allocation6 + $0x1c4] ss:$16 sps:$4 sm:$0xff]  }
 0x11c   :  { %1122 = vmatprep.subr.bf16.mxu1 %v3901_v63  ;;  %v4476_v63 = vld [vmem:[#allocation6 + $0x1ac] ss:$16 sps:$4 sm:$0xff]  }
 0x11d   :  { %1082 = vmatpush1.bf16.msra.mxu0 %v3898_v48  ;;  %v4452_v48 = vld [vmem:[#allocation6 + $0x12c] ss:$16 sps:$4 sm:$0xff]  }
 0x11e   :  { %1083 = vmatprep.subr.bf16.mxu0 %v3907_v51  ;;  %v4458_v51 = vld [vmem:[#allocation6 + $0x14c] ss:$16 sps:$4 sm:$0xff]  }
 0x11f   :  { %1123 = vmatpush1.bf16.msra.mxu1 %v3900_v1  ;;  %v4474_v1 = vld [vmem:[#allocation6 + $0x1a8] ss:$16 sps:$4 sm:$0xff]  }
 0x120   :  { %1124 = vmatprep.subr.bf16.mxu1 %v3909_v6  ;;  %v4488_v6 = vld [vmem:[#allocation6 + $0x1ec] ss:$16 sps:$4 sm:$0xff]  }
 0x121   :  { %1084 = vmatpush1.bf16.msra.mxu0 %v3906_v55  ;;  %v4464_v55 = vld [vmem:[#allocation6 + $0x16c] ss:$16 sps:$4 sm:$0xff]  }
 0x122   :  { %1085 = vmatprep.subr.bf16.mxu0 %v3915_v57  ;;  %v4462_v57 = vld [vmem:[#allocation6 + $0x168] ss:$16 sps:$4 sm:$0xff]  }
 0x123   :  { %1125 = vmatpush1.bf16.msra.mxu1 %v3908_v8  ;;  %v4494_v8 = vld [vmem:[#allocation6 + $0x20c] ss:$16 sps:$4 sm:$0xff]  }
 0x124   :  { %1126 = vmatprep.subr.bf16.mxu1 %v3917_v10 }
 0x125   :  { %1086 = vmatpush1.bf16.msra.mxu0 %v3914_v62  ;;  %v4485_v62 = vld [vmem:[#allocation6 + $0x1e4] ss:$16 sps:$4 sm:$0xff]  }
 0x126   :  { %2711 = vmatprep.subr.bf16.mxu0 %v4395_v61  ;;  %v4468_v61 = vld [vmem:[#allocation6 + $0x188] ss:$16 sps:$4 sm:$0xff]  }
 0x127   :  { %1127 = vmatpush1.bf16.msra.mxu1 %v3916_v13 }
 0x128   :  { %1088 = vmatmul.mubr.bf16.vlgmr.msra.gmra.mrb[4].mxu0 %v5293_v2  ;;  %2875 = vmatprep.subr.bf16.mxu1 %v4398_v11 }
 0x129   :  { %2712 = vmatpush1.bf16.msra.mxu0 %v4393_v0  ;;  %v4483_v0 = vld [vmem:[#allocation6 + $0x1e0] ss:$16 sps:$4 sm:$0xff]  }
 0x12a   :  { %2713 = vmatprep.subr.bf16.mxu0 %v4401_v5  ;;  %1129 = vmatmul.mubr.bf16.vlgmr.msra.gmra.mrb[4].mxu1 %v5293_v2  ;;  %v4429_v2 = vld [vmem:[#allocation6 + $0xc0] ss:$16 sps:$4 sm:$0xff]   ;;  %v4480_v5 = vld [vmem:[#allocation6 + $0x1c8] ss:$16 sps:$4 sm:$0xff]  }
 0x12b   :  { %2876 = vmatpush1.bf16.msra.mxu1 %v4396_v15 }
 0x12c   :  { %2877 = vmatprep.subr.bf16.mxu1 %v4404_v16 }
 0x12d   :  { %2714 = vmatpush1.bf16.msra.mxu0 %v4399_v7  ;;  %v4486_v7 = vld [vmem:[#allocation6 + $0x1e8] ss:$16 sps:$4 sm:$0xff]  }
 0x12e   :  { %2715 = vmatprep.subr.bf16.mxu0 %v4407_v9  ;;  %v293_v9 = vlaneseq }
 0x12f   :  { %2878 = vmatpush1.bf16.msra.mxu1 %v4402_v19 }
 0x130   :  { %2879 = vmatprep.subr.bf16.mxu1 %v4410_v20  ;;  %v5301_v10 = vshrl.u32 %v293_v9, 7  ;;  %v4551_v9 = vld [vmem:[#allocation6 + $0x344] ss:$16 sps:$4 sm:$0xff]  }
 0x131   :  { %2716 = vmatpush1.bf16.msra.mxu0 %v4405_v12  ;;  %v5306_v12 = vld [vmem:[#allocation4] sm:$0xff] }
 0x132   :  { %2717 = vmatprep.subr.bf16.mxu0 %v4413_v14  ;;  %v5304_v11 = vsub.s32 0, %v5301_v10  ;;  %v5309_v13 = vsub.s32 1, %v5301_v10 }
 0x133   :  { %2880 = vmatpush1.bf16.msra.mxu1 %v4408_v24 }
 0x134   :  { %2881 = vmatprep.subr.bf16.mxu1 %v4416_v25  ;;  %v296_v14 = vrot.slane %v5306_v12, %v5304_v11  ;;  %v300_v15 = vrot.slane %v5306_v12, %v5309_v13  ;;  %v307_v25 = vsub.s32 3, %v5301_v10 }
 0x135   :  { %2718 = vmatpush1.bf16.msra.mxu0 %v4411_v17 }
 0x136   :  { %2719 = vmatprep.subr.bf16.mxu0 %v4419_v18 }
 0x137   :  { %2882 = vmatpush1.bf16.msra.mxu1 %v4414_v27  ;;  %v4489_v27 = vld [vmem:[#allocation6 + $0x200] ss:$16 sps:$4 sm:$0xff]  }
 0x138   :  { %2883 = vmatprep.subr.bf16.mxu1 %v4422_v29 }
 0x139   :  { %2720 = vmatpush1.bf16.msra.mxu0 %v4417_v21 }
 0x13a   :  { %2721 = vmatprep.subr.bf16.mxu0 %v4425_v22 }
 0x13b   :  { %2884 = vmatpush1.bf16.msra.mxu1 %v4420_v30  ;;  %v4500_v30 = vld [vmem:[#allocation6 + $0x22c] ss:$16 sps:$4 sm:$0xff]  }
 0x13c   :  { %2885 = vmatprep.subr.bf16.mxu1 %v4428_v32  ;;  %v4495_v32 = vld [vmem:[#allocation6 + $0x220] ss:$16 sps:$4 sm:$0xff]  }
 0x13d   :  { %2722 = vmatpush1.bf16.msra.mxu0 %v4423_v26 }
 0x13e   :  { %2723 = vmatprep.subr.bf16.mxu0 %v4431_v28  ;;  %v4492_v28 = vld [vmem:[#allocation6 + $0x208] ss:$16 sps:$4 sm:$0xff]  }
 0x13f   :  { %2886 = vmatpush1.bf16.msra.mxu1 %v4426_v34  ;;  %v4503_v34 = vld [vmem:[#allocation6 + $0x244] ss:$16 sps:$4 sm:$0xff]  }
 0x140   :  { %2887 = vmatprep.subr.bf16.mxu1 %v4434_v36 }
 0x141   :  { %2724 = vmatpush1.bf16.msra.mxu0 %v4429_v2  ;;  %v4497_v2 = vld [vmem:[#allocation6 + $0x224] ss:$16 sps:$4 sm:$0xff]  }
 0x142   :  { %2725 = vmatprep.subr.bf16.mxu0 %v4437_v31  ;;  %v308_v31 = vrot.slane %v5306_v12, %v307_v25 }
 0x143   :  { %2888 = vmatpush1.bf16.msra.mxu1 %v4432_v38 }
 0x144   :  { %2889 = vmatprep.subr.bf16.mxu1 %v4440_v40  ;;  %v4501_v40 = vld [vmem:[#allocation6 + $0x240] ss:$16 sps:$4 sm:$0xff]  }
 0x145   :  { %2726 = vmatpush1.bf16.msra.mxu0 %v4435_v33  ;;  %v4498_v33 = vld [vmem:[#allocation6 + $0x228] ss:$16 sps:$4 sm:$0xff]  }
 0x146   :  { %2727 = vmatprep.subr.bf16.mxu0 %v4443_v35  ;;  %v4506_v35 = vld [vmem:[#allocation6 + $0x24c] ss:$16 sps:$4 sm:$0xff]  }
 0x147   :  { %2890 = vmatpush1.bf16.msra.mxu1 %v4438_v42 }
 0x148   :  { %2891 = vmatprep.subr.bf16.mxu1 %v4446_v44  ;;  %v4512_v44 = vld [vmem:[#allocation6 + $0x26c] ss:$16 sps:$4 sm:$0xff]  }
 0x149   :  { %2728 = vmatpush1.bf16.msra.mxu0 %v4441_v37 }
 0x14a   :  { %2729 = vmatprep.subr.bf16.mxu0 %v4449_v39 }
 0x14b   :  { %2892 = vmatpush1.bf16.msra.mxu1 %v4444_v46 }
 0x14c   :  { %2893 = vmatprep.subr.bf16.mxu1 %v4452_v48  ;;  %v4510_v48 = vld [vmem:[#allocation6 + $0x268] ss:$16 sps:$4 sm:$0xff]  }
 0x14d   :  { %2730 = vmatpush1.bf16.msra.mxu0 %v4447_v41  ;;  %v4504_v41 = vld [vmem:[#allocation6 + $0x248] ss:$16 sps:$4 sm:$0xff]  }
 0x14e   :  { %2731 = vmatprep.subr.bf16.mxu0 %v4455_v43  ;;  %v4509_v43 = vld [vmem:[#allocation6 + $0x264] ss:$16 sps:$4 sm:$0xff]  }
 0x14f   :  { %2894 = vmatpush1.bf16.msra.mxu1 %v4450_v23  ;;  %v4518_v23 = vld [vmem:[#allocation6 + $0x28c] ss:$16 sps:$4 sm:$0xff]  }
 0x150   :  { %2895 = vmatprep.subr.bf16.mxu1 %v4458_v51  ;;  %v4516_v51 = vld [vmem:[#allocation6 + $0x288] ss:$16 sps:$4 sm:$0xff]  }
 0x151   :  { %2732 = vmatpush1.bf16.msra.mxu0 %v4453_v45 }
 0x152   :  { %2733 = vmatprep.subr.bf16.mxu0 %v4461_v47  ;;  %v4507_v47 = vld [vmem:[#allocation6 + $0x260] ss:$16 sps:$4 sm:$0xff]  }
 0x153   :  { %2896 = vmatpush1.bf16.msra.mxu1 %v4456_v53  ;;  %v4524_v53 = vld [vmem:[#allocation6 + $0x2ac] ss:$16 sps:$4 sm:$0xff]  }
 0x154   :  { %2897 = vmatprep.subr.bf16.mxu1 %v4464_v55  ;;  %v4522_v55 = vld [vmem:[#allocation6 + $0x2a8] ss:$16 sps:$4 sm:$0xff]  }
 0x155   :  { %2734 = vmatpush1.bf16.msra.mxu0 %v4459_v49  ;;  %v4515_v49 = vld [vmem:[#allocation6 + $0x284] ss:$16 sps:$4 sm:$0xff]  }
 0x156   :  { %2735 = vmatprep.subr.bf16.mxu0 %v4467_v50  ;;  %v4513_v50 = vld [vmem:[#allocation6 + $0x280] ss:$16 sps:$4 sm:$0xff]  }
 0x157   :  { %2898 = vmatpush1.bf16.msra.mxu1 %v4462_v57  ;;  %v4530_v57 = vld [vmem:[#allocation6 + $0x2cc] ss:$16 sps:$4 sm:$0xff]  }
 0x158   :  { %2899 = vmatprep.subr.bf16.mxu1 %v4470_v59  ;;  %v4528_v59 = vld [vmem:[#allocation6 + $0x2c8] ss:$16 sps:$4 sm:$0xff]  }
 0x159   :  { %2736 = vmatpush1.bf16.msra.mxu0 %v4465_v52  ;;  %v4521_v52 = vld [vmem:[#allocation6 + $0x2a4] ss:$16 sps:$4 sm:$0xff]  }
 0x15a   :  { %2737 = vmatprep.subr.bf16.mxu0 %v4473_v54  ;;  %v4519_v54 = vld [vmem:[#allocation6 + $0x2a0] ss:$16 sps:$4 sm:$0xff]  }
 0x15b   :  { %2900 = vmatpush1.bf16.msra.mxu1 %v4468_v61  ;;  %v4536_v61 = vld [vmem:[#allocation6 + $0x2ec] ss:$16 sps:$4 sm:$0xff]  }
 0x15c   :  { %2901 = vmatprep.subr.bf16.mxu1 %v4476_v63  ;;  %v4534_v63 = vld [vmem:[#allocation6 + $0x2e8] ss:$16 sps:$4 sm:$0xff]  }
 0x15d   :  { %2738 = vmatpush1.bf16.msra.mxu0 %v4471_v56  ;;  %v4527_v56 = vld [vmem:[#allocation6 + $0x2c4] ss:$16 sps:$4 sm:$0xff]  }
 0x15e   :  { %2739 = vmatprep.subr.bf16.mxu0 %v4479_v58  ;;  %v4525_v58 = vld [vmem:[#allocation6 + $0x2c0] ss:$16 sps:$4 sm:$0xff]  }
 0x15f   :  { %2902 = vmatpush1.bf16.msra.mxu1 %v4474_v1  ;;  %v4542_v1 = vld [vmem:[#allocation6 + $0x30c] ss:$16 sps:$4 sm:$0xff]  }
 0x160   :  { %2903 = vmatprep.subr.bf16.mxu1 %v4482_v4  ;;  %v4540_v4 = vld [vmem:[#allocation6 + $0x308] ss:$16 sps:$4 sm:$0xff]  }
 0x161   :  { %2740 = vmatpush1.bf16.msra.mxu0 %v4477_v60  ;;  %v4533_v60 = vld [vmem:[#allocation6 + $0x2e4] ss:$16 sps:$4 sm:$0xff]  }
 0x162   :  { %2741 = vmatprep.subr.bf16.mxu0 %v4485_v62  ;;  %v4531_v62 = vld [vmem:[#allocation6 + $0x2e0] ss:$16 sps:$4 sm:$0xff]  }
 0x163   :  { %2904 = vmatpush1.bf16.msra.mxu1 %v4480_v5  ;;  %v4545_v5 = vld [vmem:[#allocation6 + $0x324] ss:$16 sps:$4 sm:$0xff]  }
 0x164   :  { %2905 = vmatprep.subr.bf16.mxu1 %v4488_v6  ;;  %v4548_v6 = vld [vmem:[#allocation6 + $0x32c] ss:$16 sps:$4 sm:$0xff]  }
 0x165   :  { %2742 = vmatpush1.bf16.msra.mxu0 %v4483_v0  ;;  %v4539_v0 = vld [vmem:[#allocation6 + $0x304] ss:$16 sps:$4 sm:$0xff]  }
 0x166   :  { %2752 = vmatprep.subr.bf16.mxu0 %v4491_v3  ;;  %v4537_v3 = vld [vmem:[#allocation6 + $0x300] ss:$16 sps:$4 sm:$0xff]  }
 0x167   :  { %2906 = vmatpush1.bf16.msra.mxu1 %v4486_v7  ;;  %v4543_v7 = vld [vmem:[#allocation6 + $0x320] ss:$16 sps:$4 sm:$0xff]  }
 0x168   :  { %2916 = vmatprep.subr.bf16.mxu1 %v4494_v8  ;;  %v4546_v8 = vld [vmem:[#allocation6 + $0x328] ss:$16 sps:$4 sm:$0xff]  }
 0x1bb   :  { %v1007_v16 = vpop.f32.mrb[0].mxu0 }
 0x1bc   :  { %v1008_v17 = vadd.f32 %v1007_v16, %v296_v14  ;;  %v1009_v18 = vpop.f32.mrb[1].mxu0  ;;  %v4554_v14 = vld [vmem:[#allocation6 + $0x34c] ss:$16 sps:$4 sm:$0xff]   ;;  %v4552_v16 = vld [vmem:[#allocation6 + $0x348] ss:$16 sps:$4 sm:$0xff]  }
 0x1bd   :  { %v1010_v19 = vadd.f32 %v1009_v18, %v300_v15  ;;  %v1011_v20 = vpop.f32.mrb[2].mxu0  ;;  %v5319_v36 = vpop.f32.mrb[0].mxu1  ;;  %v4549_v15 = vld [vmem:[#allocation6 + $0x340] ss:$16 sps:$4 sm:$0xff]   ;;  %v4560_v18 = vld [vmem:[#allocation6 + $0x36c] ss:$16 sps:$4 sm:$0xff]  }
 0x1be   :  { %v1137_v21 = vmax.f32 %v1008_v17, 0.0  ;;  %v1012_v22 = vpop.f32.mrb[3].mxu0  ;;  %v1050_v37 = vpop.f32.mrb[1].mxu1  ;;  %v4557_v17 = vld [vmem:[#allocation6 + $0x364] ss:$16 sps:$4 sm:$0xff]  }
 0x1bf   :  { %v1138_v24 = vmax.f32 %v1010_v19, 0.0  ;;  %v1051_v38 = vadd.f32 %v1050_v37, %v308_v31  ;;  %v1052_v39 = vpop.f32.mrb[2].mxu1  ;;  %v4555_v19 = vld [vmem:[#allocation6 + $0x360] ss:$16 sps:$4 sm:$0xff]   ;;  %v4558_v20 = vld [vmem:[#allocation6 + $0x368] ss:$16 sps:$4 sm:$0xff]  }
 0x1c0   :  { %v1145_v29 = vpack.c.bf16 %v1137_v21, %v1137_v21  ;;  %v1053_v42 = vpop.f32.mrb[3].mxu1  ;;  %v4563_v21 = vld [vmem:[#allocation6 + $0x384] ss:$16 sps:$4 sm:$0xff]   ;;  %v4566_v22 = vld [vmem:[#allocation6 + $0x38c] ss:$16 sps:$4 sm:$0xff]  }
 0x1c1   :  { %v1146_v26 = vpack.c.bf16 %v1138_v24, %v1138_v24  ;;  %v1140_v45 = vmax.f32 %v1051_v38, 0.0  ;;  %v303_v24 = vsub.s32 2, %v5301_v10  ;;  %v4570_v31 = vld [vmem:[#allocation6 + $0x3a8] ss:$16 sps:$4 sm:$0xff]   ;;  %v4573_v37 = vld [vmem:[#allocation6 + $0x3c0] ss:$16 sps:$4 sm:$0xff]  }
 0x1c2   :  { %v4576_v38 = vld [vmem:[#allocation6 + $0x3c8] ss:$16 sps:$4 sm:$0xff]  }
 0x1c3   :  { %2743 = vmatprep.mubr.bf16.mxu0 %v1146_v26  ;;  %2907 = vmatprep.mubr.bf16.mxu1 %v1146_v26  ;;  %v1148_v46 = vpack.c.bf16 %v1140_v45, %v1140_v45  ;;  %v4561_v26 = vld [vmem:[#allocation6 + $0x380] ss:$16 sps:$4 sm:$0xff]  }
 0x1c4   :  { %2744 = vmatmul.mubr.bf16.vlgmr.msra.gmra.mrb[8].mxu0 %v1145_v29  ;;  %2908 = vmatmul.mubr.bf16.vlgmr.msra.gmra.mrb[8].mxu1 %v1145_v29  ;;  %v4572_v29 = vld [vmem:[#allocation6 + $0x3ac] ss:$16 sps:$4 sm:$0xff]   ;;  %v4579_v45 = vld [vmem:[#allocation6 + $0x3e0] ss:$16 sps:$4 sm:$0xff]  }
 0x1c5   :  { %2753 = vmatpush1.bf16.msra.mxu0 %v4489_v27  ;;  %2917 = vmatpush1.bf16.msra.mxu1 %v4492_v28  ;;  %v4564_v27 = vld [vmem:[#allocation6 + $0x388] ss:$16 sps:$4 sm:$0xff]   ;;  %v4569_v28 = vld [vmem:[#allocation6 + $0x3a4] ss:$16 sps:$4 sm:$0xff]  }
 0x1c6   :  { %2754 = vmatprep.subr.bf16.mxu0 %v4497_v2  ;;  %2918 = vmatprep.subr.bf16.mxu1 %v4500_v30  ;;  %v304_v2 = vrot.slane %v5306_v12, %v303_v24  ;;  %v4567_v30 = vld [vmem:[#allocation6 + $0x3a0] ss:$16 sps:$4 sm:$0xff]  }
 0x1c7   :  { %2784 = vmatprep.mubr.bf16.mxu0 %v1148_v46  ;;  %2948 = vmatprep.mubr.bf16.mxu1 %v1148_v46  ;;  %v4582_v46 = vld [vmem:[#allocation6 + $0x3e8] ss:$16 sps:$4 sm:$0xff]  }
 0x1c9   :  { %2755 = vmatpush1.bf16.msra.mxu0 %v4495_v32  ;;  %2919 = vmatpush1.bf16.msra.mxu1 %v4498_v33  ;;  %v315_v32 = vsub.s32 5, %v5301_v10  ;;  %v4575_v33 = vld [vmem:[#allocation6 + $0x3c4] ss:$16 sps:$4 sm:$0xff]  }
 0x1ca   :  { %2756 = vmatprep.subr.bf16.mxu0 %v4503_v34  ;;  %2920 = vmatprep.subr.bf16.mxu1 %v4506_v35  ;;  %v4578_v34 = vld [vmem:[#allocation6 + $0x3cc] ss:$16 sps:$4 sm:$0xff]   ;;  %v1049_v35 = vadd.f32 %v5319_v36, %v304_v2  ;;  %v4630_v2 = vld [vmem:[#allocation6 + $0x4e8] ss:$16 sps:$4 sm:$0xff]  }
 0x1cb   :  { %v316_v39 = vrot.slane %v5306_v12, %v315_v32  ;;  %v4633_v32 = vld [vmem:[#allocation6 + $0x500] ss:$16 sps:$4 sm:$0xff]  }
 0x1cd   :  { %2757 = vmatpush1.bf16.msra.mxu0 %v4501_v40  ;;  %2921 = vmatpush1.bf16.msra.mxu1 %v4504_v41  ;;  %v4581_v40 = vld [vmem:[#allocation6 + $0x3e4] ss:$16 sps:$4 sm:$0xff]   ;;  %v4584_v41 = vld [vmem:[#allocation6 + $0x3ec] ss:$16 sps:$4 sm:$0xff]  }
 0x1ce   :  { %2758 = vmatprep.subr.bf16.mxu0 %v4509_v43  ;;  %2922 = vmatprep.subr.bf16.mxu1 %v4512_v44  ;;  %v1139_v43 = vmax.f32 %v1049_v35, 0.0  ;;  %v4644_v35 = vld [vmem:[#allocation6 + $0x52c] ss:$16 sps:$4 sm:$0xff]  }
 0x1d1   :  { %2759 = vmatpush1.bf16.msra.mxu0 %v4507_v47  ;;  %2923 = vmatpush1.bf16.msra.mxu1 %v4510_v48  ;;  %v4587_v48 = vld [vmem:[#allocation6 + $0x404] ss:$16 sps:$4 sm:$0xff]  }
 0x1d2   :  { %2760 = vmatprep.subr.bf16.mxu0 %v4515_v49  ;;  %2924 = vmatprep.subr.bf16.mxu1 %v4518_v23  ;;  %v4590_v49 = vld [vmem:[#allocation6 + $0x40c] ss:$16 sps:$4 sm:$0xff]  }
 0x1d5   :  { %2761 = vmatpush1.bf16.msra.mxu0 %v4513_v50  ;;  %2925 = vmatpush1.bf16.msra.mxu1 %v4516_v51  ;;  %v1147_v51 = vpack.c.bf16 %v1139_v43, %v1139_v43  ;;  %v4648_v43 = vld [vmem:[#allocation6 + $0x548] ss:$16 sps:$4 sm:$0xff]  }
 0x1d6   :  { %2762 = vmatprep.subr.bf16.mxu0 %v4521_v52  ;;  %2926 = vmatprep.subr.bf16.mxu1 %v4524_v53  ;;  %v4585_v52 = vld [vmem:[#allocation6 + $0x400] ss:$16 sps:$4 sm:$0xff]   ;;  %v4588_v53 = vld [vmem:[#allocation6 + $0x408] ss:$16 sps:$4 sm:$0xff]  }
 0x1d9   :  { %2763 = vmatpush1.bf16.msra.mxu0 %v4519_v54  ;;  %2927 = vmatpush1.bf16.msra.mxu1 %v4522_v55  ;;  %v4593_v54 = vld [vmem:[#allocation6 + $0x424] ss:$16 sps:$4 sm:$0xff]   ;;  %v4596_v55 = vld [vmem:[#allocation6 + $0x42c] ss:$16 sps:$4 sm:$0xff]  }
 0x1da   :  { %2764 = vmatprep.subr.bf16.mxu0 %v4527_v56  ;;  %2928 = vmatprep.subr.bf16.mxu1 %v4530_v57  ;;  %v4591_v57 = vld [vmem:[#allocation6 + $0x420] ss:$16 sps:$4 sm:$0xff]  }
 0x1dd   :  { %2765 = vmatpush1.bf16.msra.mxu0 %v4525_v58  ;;  %2929 = vmatpush1.bf16.msra.mxu1 %v4528_v59  ;;  %v4594_v58 = vld [vmem:[#allocation6 + $0x428] ss:$16 sps:$4 sm:$0xff]   ;;  %v4599_v59 = vld [vmem:[#allocation6 + $0x444] ss:$16 sps:$4 sm:$0xff]  }
 0x1de   :  { %2766 = vmatprep.subr.bf16.mxu0 %v4533_v60  ;;  %2930 = vmatprep.subr.bf16.mxu1 %v4536_v61  ;;  %v4602_v60 = vld [vmem:[#allocation6 + $0x44c] ss:$16 sps:$4 sm:$0xff]  }
 0x1e1   :  { %2767 = vmatpush1.bf16.msra.mxu0 %v4531_v62  ;;  %2931 = vmatpush1.bf16.msra.mxu1 %v4534_v63 }
 0x1e2   :  { %2768 = vmatprep.subr.bf16.mxu0 %v4539_v0  ;;  %2932 = vmatprep.subr.bf16.mxu1 %v4542_v1  ;;  %v4597_v0 = vld [vmem:[#allocation6 + $0x440] ss:$16 sps:$4 sm:$0xff]   ;;  %v4600_v1 = vld [vmem:[#allocation6 + $0x448] ss:$16 sps:$4 sm:$0xff]  }
 0x1e5   :  { %2769 = vmatpush1.bf16.msra.mxu0 %v4537_v3  ;;  %2933 = vmatpush1.bf16.msra.mxu1 %v4540_v4  ;;  %v4605_v4 = vld [vmem:[#allocation6 + $0x464] ss:$16 sps:$4 sm:$0xff]  }
 0x1e6   :  { %2770 = vmatprep.subr.bf16.mxu0 %v4545_v5  ;;  %2934 = vmatprep.subr.bf16.mxu1 %v4548_v6  ;;  %v4608_v5 = vld [vmem:[#allocation6 + $0x46c] ss:$16 sps:$4 sm:$0xff]   ;;  %v4603_v6 = vld [vmem:[#allocation6 + $0x460] ss:$16 sps:$4 sm:$0xff]  }
 0x1e9   :  { %2771 = vmatpush1.bf16.msra.mxu0 %v4543_v7  ;;  %2935 = vmatpush1.bf16.msra.mxu1 %v4546_v8  ;;  %v4606_v7 = vld [vmem:[#allocation6 + $0x468] ss:$16 sps:$4 sm:$0xff]   ;;  %v4611_v8 = vld [vmem:[#allocation6 + $0x484] ss:$16 sps:$4 sm:$0xff]  }
 0x1ea   :  { %2772 = vmatprep.subr.bf16.mxu0 %v4551_v9  ;;  %2936 = vmatprep.subr.bf16.mxu1 %v4554_v14  ;;  %v4614_v9 = vld [vmem:[#allocation6 + $0x48c] ss:$16 sps:$4 sm:$0xff]   ;;  %v4609_v14 = vld [vmem:[#allocation6 + $0x480] ss:$16 sps:$4 sm:$0xff]  }
 0x1ed   :  { %2773 = vmatpush1.bf16.msra.mxu0 %v4549_v15  ;;  %2937 = vmatpush1.bf16.msra.mxu1 %v4552_v16  ;;  %v4612_v15 = vld [vmem:[#allocation6 + $0x488] ss:$16 sps:$4 sm:$0xff]   ;;  %v4617_v16 = vld [vmem:[#allocation6 + $0x4a4] ss:$16 sps:$4 sm:$0xff]  }
 0x1ee   :  { %2774 = vmatprep.subr.bf16.mxu0 %v4557_v17  ;;  %2938 = vmatprep.subr.bf16.mxu1 %v4560_v18  ;;  %v4620_v17 = vld [vmem:[#allocation6 + $0x4ac] ss:$16 sps:$4 sm:$0xff]   ;;  %v4615_v18 = vld [vmem:[#allocation6 + $0x4a0] ss:$16 sps:$4 sm:$0xff]  }
 0x1f1   :  { %2775 = vmatpush1.bf16.msra.mxu0 %v4555_v19  ;;  %2939 = vmatpush1.bf16.msra.mxu1 %v4558_v20  ;;  %v4618_v19 = vld [vmem:[#allocation6 + $0x4a8] ss:$16 sps:$4 sm:$0xff]   ;;  %v4623_v20 = vld [vmem:[#allocation6 + $0x4c4] ss:$16 sps:$4 sm:$0xff]  }
 0x1f2   :  { %2776 = vmatprep.subr.bf16.mxu0 %v4563_v21  ;;  %2940 = vmatprep.subr.bf16.mxu1 %v4566_v22  ;;  %v4626_v21 = vld [vmem:[#allocation6 + $0x4cc] ss:$16 sps:$4 sm:$0xff]   ;;  %v4621_v22 = vld [vmem:[#allocation6 + $0x4c0] ss:$16 sps:$4 sm:$0xff]  }
 0x1f5   :  { %2777 = vmatpush1.bf16.msra.mxu0 %v4561_v26  ;;  %2941 = vmatpush1.bf16.msra.mxu1 %v4564_v27  ;;  %v4624_v26 = vld [vmem:[#allocation6 + $0x4c8] ss:$16 sps:$4 sm:$0xff]   ;;  %v4629_v27 = vld [vmem:[#allocation6 + $0x4e4] ss:$16 sps:$4 sm:$0xff]  }
 0x1f6   :  { %2778 = vmatprep.subr.bf16.mxu0 %v4569_v28  ;;  %2942 = vmatprep.subr.bf16.mxu1 %v4572_v29  ;;  %v4632_v28 = vld [vmem:[#allocation6 + $0x4ec] ss:$16 sps:$4 sm:$0xff]   ;;  %v4627_v29 = vld [vmem:[#allocation6 + $0x4e0] ss:$16 sps:$4 sm:$0xff]  }
 0x1f9   :  { %2779 = vmatpush1.bf16.msra.mxu0 %v4567_v30  ;;  %2943 = vmatpush1.bf16.msra.mxu1 %v4570_v31  ;;  %v4635_v30 = vld [vmem:[#allocation6 + $0x504] ss:$16 sps:$4 sm:$0xff]   ;;  %v4638_v31 = vld [vmem:[#allocation6 + $0x50c] ss:$16 sps:$4 sm:$0xff]  }
 0x1fa   :  { %2780 = vmatprep.subr.bf16.mxu0 %v4575_v33  ;;  %2944 = vmatprep.subr.bf16.mxu1 %v4578_v34  ;;  %v4636_v33 = vld [vmem:[#allocation6 + $0x508] ss:$16 sps:$4 sm:$0xff]   ;;  %v4641_v34 = vld [vmem:[#allocation6 + $0x524] ss:$16 sps:$4 sm:$0xff]  }
 0x1fb   :  { %v5328_v42 = vpop.f32.mrb[4].mxu0 }
 0x1fc   :  { %v1091_v44 = vpop.f32.mrb[5].mxu0 }
 0x1fd   :  { %2781 = vmatpush1.bf16.msra.mxu0 %v4573_v37  ;;  %2945 = vmatpush1.bf16.msra.mxu1 %v4576_v38  ;;  %v1092_v47 = vadd.f32 %v1091_v44, %v316_v39  ;;  %v1093_v36 = vpop.f32.mrb[6].mxu0  ;;  %v5330_v61 = vpop.f32.mrb[4].mxu1  ;;  %v4639_v37 = vld [vmem:[#allocation6 + $0x520] ss:$16 sps:$4 sm:$0xff]   ;;  %v4642_v38 = vld [vmem:[#allocation6 + $0x528] ss:$16 sps:$4 sm:$0xff]  }
 0x1fe   :  { %2782 = vmatprep.subr.bf16.mxu0 %v4581_v40  ;;  %2946 = vmatprep.subr.bf16.mxu1 %v4584_v41  ;;  %v1094_v23 = vpop.f32.mrb[7].mxu0  ;;  %v5332_v62 = vpop.f32.mrb[5].mxu1  ;;  %v4647_v39 = vld [vmem:[#allocation6 + $0x544] ss:$16 sps:$4 sm:$0xff]   ;;  %v4650_v40 = vld [vmem:[#allocation6 + $0x54c] ss:$16 sps:$4 sm:$0xff]  }
 0x1ff   :  { %v1142_v50 = vmax.f32 %v1092_v47, 0.0  ;;  %v1134_v63 = vpop.f32.mrb[6].mxu1  ;;  %v4645_v41 = vld [vmem:[#allocation6 + $0x540] ss:$16 sps:$4 sm:$0xff]   ;;  %v4653_v44 = vld [vmem:[#allocation6 + $0x564] ss:$16 sps:$4 sm:$0xff]  }
 0x200   :  { %v1135_v3 = vpop.f32.mrb[7].mxu1  ;;  %v4654_v47 = vld [vmem:[#allocation6 + $0x568] ss:$16 sps:$4 sm:$0xff]   ;;  %v4659_v36 = vld [vmem:[#allocation6 + $0x584] ss:$16 sps:$4 sm:$0xff]  }
 0x201   :  { %2783 = vmatpush1.bf16.msra.mxu0 %v4579_v45  ;;  %2947 = vmatpush1.bf16.msra.mxu1 %v4582_v46  ;;  %v1150_v56 = vpack.c.bf16 %v1142_v50, %v1142_v50  ;;  %v4656_v45 = vld [vmem:[#allocation6 + $0x56c] ss:$16 sps:$4 sm:$0xff]   ;;  %v4651_v46 = vld [vmem:[#allocation6 + $0x560] ss:$16 sps:$4 sm:$0xff]   ;;  %v4660_v50 = vld [vmem:[#allocation6 + $0x588] ss:$16 sps:$4 sm:$0xff]  }
 0x202   :  { %2793 = vmatprep.subr.bf16.mxu0 %v4587_v48  ;;  %2957 = vmatprep.subr.bf16.mxu1 %v4590_v49  ;;  %v4662_v48 = vld [vmem:[#allocation6 + $0x58c] ss:$16 sps:$4 sm:$0xff]   ;;  %v311_v49 = vsub.s32 4, %v5301_v10  ;;  %v4657_v23 = vld [vmem:[#allocation6 + $0x580] ss:$16 sps:$4 sm:$0xff]  }
 0x203   :  { %v4669_v63 = vld [vmem:[#allocation6 + $0x5c0] ss:$16 sps:$4 sm:$0xff]   ;;  %v4680_v3 = vld [vmem:[#allocation6 + $0x5ec] ss:$16 sps:$4 sm:$0xff]  }
 0x204   :  { %2785 = vmatmul.mubr.bf16.vlgmr.msra.gmra.mrb[8].mxu0 %v1147_v51  ;;  %2949 = vmatmul.mubr.bf16.vlgmr.msra.gmra.mrb[8].mxu1 %v1147_v51  ;;  %v4665_v51 = vld [vmem:[#allocation6 + $0x5a4] ss:$16 sps:$4 sm:$0xff]  }
 0x205   :  { %2794 = vmatpush1.bf16.msra.mxu0 %v4585_v52  ;;  %2958 = vmatpush1.bf16.msra.mxu1 %v4588_v53  ;;  %v4668_v52 = vld [vmem:[#allocation6 + $0x5ac] ss:$16 sps:$4 sm:$0xff]   ;;  %v323_v53 = vsub.s32 7, %v5301_v10 }
 0x206   :  { %2795 = vmatprep.subr.bf16.mxu0 %v4593_v54  ;;  %2959 = vmatprep.subr.bf16.mxu1 %v4596_v55  ;;  %v312_v54 = vrot.slane %v5306_v12, %v311_v49  ;;  %v4663_v55 = vld [vmem:[#allocation6 + $0x5a0] ss:$16 sps:$4 sm:$0xff]   ;;  %v4734_v49 = vld [vmem:[#allocation6 + $0x70c] ss:$16 sps:$4 sm:$0xff]  }
 0x207   :  { %2825 = vmatprep.mubr.bf16.mxu0 %v1150_v56  ;;  %2989 = vmatprep.mubr.bf16.mxu1 %v1150_v56  ;;  %v4666_v56 = vld [vmem:[#allocation6 + $0x5a8] ss:$16 sps:$4 sm:$0xff]  }
 0x209   :  { %2796 = vmatpush1.bf16.msra.mxu0 %v4591_v57  ;;  %2960 = vmatpush1.bf16.msra.mxu1 %v4594_v58  ;;  %v4671_v57 = vld [vmem:[#allocation6 + $0x5c4] ss:$16 sps:$4 sm:$0xff]   ;;  %v4674_v58 = vld [vmem:[#allocation6 + $0x5cc] ss:$16 sps:$4 sm:$0xff]  }
 0x20a   :  { %2797 = vmatprep.subr.bf16.mxu0 %v4599_v59  ;;  %2961 = vmatprep.subr.bf16.mxu1 %v4602_v60  ;;  %v324_v59 = vrot.slane %v5306_v12, %v323_v53  ;;  %v1090_v60 = vadd.f32 %v5328_v42, %v312_v54  ;;  %v4735_v53 = vld [vmem:[#allocation6 + $0x720] ss:$16 sps:$4 sm:$0xff]   ;;  %v4738_v54 = vld [vmem:[#allocation6 + $0x728] ss:$16 sps:$4 sm:$0xff]  }
 0x20d   :  { %2798 = vmatpush1.bf16.msra.mxu0 %v4597_v0  ;;  %2962 = vmatpush1.bf16.msra.mxu1 %v4600_v1  ;;  %v4672_v0 = vld [vmem:[#allocation6 + $0x5c8] ss:$16 sps:$4 sm:$0xff]   ;;  %v4677_v1 = vld [vmem:[#allocation6 + $0x5e4] ss:$16 sps:$4 sm:$0xff]  }
 0x20e   :  { %2799 = vmatprep.subr.bf16.mxu0 %v4605_v4  ;;  %2963 = vmatprep.subr.bf16.mxu1 %v4608_v5  ;;  %v1133_v4 = vadd.f32 %v5332_v62, %v324_v59  ;;  %v1141_v5 = vmax.f32 %v1090_v60, 0.0  ;;  %v4749_v59 = vld [vmem:[#allocation6 + $0x764] ss:$16 sps:$4 sm:$0xff]   ;;  %v4752_v60 = vld [vmem:[#allocation6 + $0x76c] ss:$16 sps:$4 sm:$0xff]  }
 0x210   :  { %v1144_v42 = vmax.f32 %v1133_v4, 0.0  ;;  %v4753_v4 = vld [vmem:[#allocation6 + $0x780] ss:$16 sps:$4 sm:$0xff]  }
 0x211   :  { %2800 = vmatpush1.bf16.msra.mxu0 %v4603_v6  ;;  %2964 = vmatpush1.bf16.msra.mxu1 %v4606_v7  ;;  %v4675_v6 = vld [vmem:[#allocation6 + $0x5e0] ss:$16 sps:$4 sm:$0xff]   ;;  %v4678_v7 = vld [vmem:[#allocation6 + $0x5e8] ss:$16 sps:$4 sm:$0xff]  }
 0x212   :  { %2801 = vmatprep.subr.bf16.mxu0 %v4611_v8  ;;  %2965 = vmatprep.subr.bf16.mxu1 %v4614_v9  ;;  %v4683_v8 = vld [vmem:[#allocation6 + $0x604] ss:$16 sps:$4 sm:$0xff]   ;;  %v4686_v9 = vld [vmem:[#allocation6 + $0x60c] ss:$16 sps:$4 sm:$0xff]   ;;  %v1152_v62 = vpack.c.bf16 %v1144_v42, %v1144_v42  ;;  %v4762_v42 = vld [vmem:[#allocation6 + $0x7a8] ss:$16 sps:$4 sm:$0xff]  }
 0x215   :  { %2802 = vmatpush1.bf16.msra.mxu0 %v4609_v14  ;;  %2966 = vmatpush1.bf16.msra.mxu1 %v4612_v15  ;;  %v1149_v14 = vpack.c.bf16 %v1141_v5, %v1141_v5  ;;  %v4681_v15 = vld [vmem:[#allocation6 + $0x600] ss:$16 sps:$4 sm:$0xff]   ;;  %v4756_v5 = vld [vmem:[#allocation6 + $0x788] ss:$16 sps:$4 sm:$0xff]  }
 0x216   :  { %2803 = vmatprep.subr.bf16.mxu0 %v4617_v16  ;;  %2967 = vmatprep.subr.bf16.mxu1 %v4620_v17  ;;  %v4684_v16 = vld [vmem:[#allocation6 + $0x608] ss:$16 sps:$4 sm:$0xff]   ;;  %v4689_v17 = vld [vmem:[#allocation6 + $0x624] ss:$16 sps:$4 sm:$0xff]  }
 0x219   :  { %2804 = vmatpush1.bf16.msra.mxu0 %v4615_v18  ;;  %2968 = vmatpush1.bf16.msra.mxu1 %v4618_v19  ;;  %v4692_v18 = vld [vmem:[#allocation6 + $0x62c] ss:$16 sps:$4 sm:$0xff]   ;;  %v4687_v19 = vld [vmem:[#allocation6 + $0x620] ss:$16 sps:$4 sm:$0xff]  }
 0x21a   :  { %2805 = vmatprep.subr.bf16.mxu0 %v4623_v20  ;;  %2969 = vmatprep.subr.bf16.mxu1 %v4626_v21  ;;  %v4690_v20 = vld [vmem:[#allocation6 + $0x628] ss:$16 sps:$4 sm:$0xff]   ;;  %v4695_v21 = vld [vmem:[#allocation6 + $0x644] ss:$16 sps:$4 sm:$0xff]  }
 0x21d   :  { %2806 = vmatpush1.bf16.msra.mxu0 %v4621_v22  ;;  %2970 = vmatpush1.bf16.msra.mxu1 %v4624_v26  ;;  %v4698_v22 = vld [vmem:[#allocation6 + $0x64c] ss:$16 sps:$4 sm:$0xff]   ;;  %v4693_v26 = vld [vmem:[#allocation6 + $0x640] ss:$16 sps:$4 sm:$0xff]  }
 0x21e   :  { %2807 = vmatprep.subr.bf16.mxu0 %v4629_v27  ;;  %2971 = vmatprep.subr.bf16.mxu1 %v4632_v28  ;;  %v4696_v27 = vld [vmem:[#allocation6 + $0x648] ss:$16 sps:$4 sm:$0xff]   ;;  %v4701_v28 = vld [vmem:[#allocation6 + $0x664] ss:$16 sps:$4 sm:$0xff]  }
 0x221   :  { %2808 = vmatpush1.bf16.msra.mxu0 %v4627_v29  ;;  %2972 = vmatpush1.bf16.msra.mxu1 %v4630_v2  ;;  %v4704_v29 = vld [vmem:[#allocation6 + $0x66c] ss:$16 sps:$4 sm:$0xff]   ;;  %v4699_v2 = vld [vmem:[#allocation6 + $0x660] ss:$16 sps:$4 sm:$0xff]  }
 0x222   :  { %2809 = vmatprep.subr.bf16.mxu0 %v4635_v30  ;;  %2973 = vmatprep.subr.bf16.mxu1 %v4638_v31  ;;  %v4702_v30 = vld [vmem:[#allocation6 + $0x668] ss:$16 sps:$4 sm:$0xff]   ;;  %v4707_v31 = vld [vmem:[#allocation6 + $0x684] ss:$16 sps:$4 sm:$0xff]  }
 0x225   :  { %2810 = vmatpush1.bf16.msra.mxu0 %v4633_v32  ;;  %2974 = vmatpush1.bf16.msra.mxu1 %v4636_v33  ;;  %v4710_v32 = vld [vmem:[#allocation6 + $0x68c] ss:$16 sps:$4 sm:$0xff]   ;;  %v4705_v33 = vld [vmem:[#allocation6 + $0x680] ss:$16 sps:$4 sm:$0xff]  }
 0x226   :  { %2811 = vmatprep.subr.bf16.mxu0 %v4641_v34  ;;  %2975 = vmatprep.subr.bf16.mxu1 %v4644_v35  ;;  %v4708_v34 = vld [vmem:[#allocation6 + $0x688] ss:$16 sps:$4 sm:$0xff]   ;;  %v4713_v35 = vld [vmem:[#allocation6 + $0x6a4] ss:$16 sps:$4 sm:$0xff]  }
 0x229   :  { %2812 = vmatpush1.bf16.msra.mxu0 %v4639_v37  ;;  %2976 = vmatpush1.bf16.msra.mxu1 %v4642_v38  ;;  %v4716_v37 = vld [vmem:[#allocation6 + $0x6ac] ss:$16 sps:$4 sm:$0xff]   ;;  %v4711_v38 = vld [vmem:[#allocation6 + $0x6a0] ss:$16 sps:$4 sm:$0xff]  }
 0x22a   :  { %2813 = vmatprep.subr.bf16.mxu0 %v4647_v39  ;;  %2977 = vmatprep.subr.bf16.mxu1 %v4650_v40  ;;  %v4714_v39 = vld [vmem:[#allocation6 + $0x6a8] ss:$16 sps:$4 sm:$0xff]   ;;  %v4719_v40 = vld [vmem:[#allocation6 + $0x6c4] ss:$16 sps:$4 sm:$0xff]  }
 0x22d   :  { %2814 = vmatpush1.bf16.msra.mxu0 %v4645_v41  ;;  %2978 = vmatpush1.bf16.msra.mxu1 %v4648_v43  ;;  %v4722_v41 = vld [vmem:[#allocation6 + $0x6cc] ss:$16 sps:$4 sm:$0xff]   ;;  %v4717_v43 = vld [vmem:[#allocation6 + $0x6c0] ss:$16 sps:$4 sm:$0xff]  }
 0x22e   :  { %2815 = vmatprep.subr.bf16.mxu0 %v4653_v44  ;;  %2979 = vmatprep.subr.bf16.mxu1 %v4656_v45  ;;  %v4720_v44 = vld [vmem:[#allocation6 + $0x6c8] ss:$16 sps:$4 sm:$0xff]   ;;  %v4725_v45 = vld [vmem:[#allocation6 + $0x6e4] ss:$16 sps:$4 sm:$0xff]  }
 0x231   :  { %2816 = vmatpush1.bf16.msra.mxu0 %v4651_v46  ;;  %2980 = vmatpush1.bf16.msra.mxu1 %v4654_v47  ;;  %v4728_v46 = vld [vmem:[#allocation6 + $0x6ec] ss:$16 sps:$4 sm:$0xff]   ;;  %v4723_v47 = vld [vmem:[#allocation6 + $0x6e0] ss:$16 sps:$4 sm:$0xff]  }
 0x232   :  { %2817 = vmatprep.subr.bf16.mxu0 %v4659_v36  ;;  %2981 = vmatprep.subr.bf16.mxu1 %v4662_v48  ;;  %v4726_v36 = vld [vmem:[#allocation6 + $0x6e8] ss:$16 sps:$4 sm:$0xff]   ;;  %v4731_v48 = vld [vmem:[#allocation6 + $0x704] ss:$16 sps:$4 sm:$0xff]  }
 0x235   :  { %2818 = vmatpush1.bf16.msra.mxu0 %v4657_v23  ;;  %2982 = vmatpush1.bf16.msra.mxu1 %v4660_v50  ;;  %v4729_v23 = vld [vmem:[#allocation6 + $0x700] ss:$16 sps:$4 sm:$0xff]   ;;  %v4732_v50 = vld [vmem:[#allocation6 + $0x708] ss:$16 sps:$4 sm:$0xff]  }
 0x236   :  { %2819 = vmatprep.subr.bf16.mxu0 %v4665_v51  ;;  %2983 = vmatprep.subr.bf16.mxu1 %v4668_v52  ;;  %v4737_v51 = vld [vmem:[#allocation6 + $0x724] ss:$16 sps:$4 sm:$0xff]   ;;  %v4740_v52 = vld [vmem:[#allocation6 + $0x72c] ss:$16 sps:$4 sm:$0xff]  }
 0x239   :  { %2820 = vmatpush1.bf16.msra.mxu0 %v4663_v55  ;;  %2984 = vmatpush1.bf16.msra.mxu1 %v4666_v56  ;;  %v4743_v55 = vld [vmem:[#allocation6 + $0x744] ss:$16 sps:$4 sm:$0xff]   ;;  %v4746_v56 = vld [vmem:[#allocation6 + $0x74c] ss:$16 sps:$4 sm:$0xff]  }
 0x23a   :  { %2821 = vmatprep.subr.bf16.mxu0 %v4671_v57  ;;  %2985 = vmatprep.subr.bf16.mxu1 %v4674_v58  ;;  %v4741_v57 = vld [vmem:[#allocation6 + $0x740] ss:$16 sps:$4 sm:$0xff]   ;;  %v4744_v58 = vld [vmem:[#allocation6 + $0x748] ss:$16 sps:$4 sm:$0xff]  }
 0x23d   :  { %2822 = vmatpush1.bf16.msra.mxu0 %v4669_v63  ;;  %2986 = vmatpush1.bf16.msra.mxu1 %v4672_v0  ;;  %v4747_v63 = vld [vmem:[#allocation6 + $0x760] ss:$16 sps:$4 sm:$0xff]   ;;  %v4750_v0 = vld [vmem:[#allocation6 + $0x768] ss:$16 sps:$4 sm:$0xff]  }
 0x23e   :  { %2823 = vmatprep.subr.bf16.mxu0 %v4677_v1  ;;  %2987 = vmatprep.subr.bf16.mxu1 %v4680_v3  ;;  %v4755_v1 = vld [vmem:[#allocation6 + $0x784] ss:$16 sps:$4 sm:$0xff]   ;;  %v4758_v3 = vld [vmem:[#allocation6 + $0x78c] ss:$16 sps:$4 sm:$0xff]  }
 0x241   :  { %2824 = vmatpush1.bf16.msra.mxu0 %v4675_v6  ;;  %2988 = vmatpush1.bf16.msra.mxu1 %v4678_v7  ;;  %v319_v6 = vsub.s32 6, %v5301_v10  ;;  %v4761_v7 = vld [vmem:[#allocation6 + $0x7a4] ss:$16 sps:$4 sm:$0xff]   ;;  %v4809_v10 = vld [vmem:[%s5412_s7] sm:$0xff]  }
 0x242   :  { %2834 = vmatprep.subr.bf16.mxu0 %v4683_v8  ;;  %2998 = vmatprep.subr.bf16.mxu1 %v4686_v9  ;;  %v4764_v8 = vld [vmem:[#allocation6 + $0x7ac] ss:$16 sps:$4 sm:$0xff]   ;;  %v4759_v9 = vld [vmem:[#allocation6 + $0x7a0] ss:$16 sps:$4 sm:$0xff]  }
 0x244   :  { %2826 = vmatmul.mubr.bf16.vlgmr.msra.gmra.mrb[8].mxu0 %v1149_v14  ;;  %2990 = vmatmul.mubr.bf16.vlgmr.msra.gmra.mrb[8].mxu1 %v1149_v14  ;;  %v320_v14 = vrot.slane %v5306_v12, %v319_v6  ;;  %v4777_v12 = vld [vmem:[#allocation7 + $0x40] sm:$0xff]  }
 0x245   :  { %2835 = vmatpush1.bf16.msra.mxu0 %v4681_v15  ;;  %2999 = vmatpush1.bf16.msra.mxu1 %v4684_v16  ;;  %v4767_v15 = vld [vmem:[#allocation6 + $0x7c4] ss:$16 sps:$4 sm:$0xff]   ;;  %v4770_v16 = vld [vmem:[#allocation6 + $0x7cc] ss:$16 sps:$4 sm:$0xff]  }
 0x246   :  { %2836 = vmatprep.subr.bf16.mxu0 %v4689_v17  ;;  %3000 = vmatprep.subr.bf16.mxu1 %v4692_v18  ;;  %v4765_v17 = vld [vmem:[#allocation6 + $0x7c0] ss:$16 sps:$4 sm:$0xff]   ;;  %v4768_v18 = vld [vmem:[#allocation6 + $0x7c8] ss:$16 sps:$4 sm:$0xff]  }
 0x247   :  { %2866 = vmatprep.mubr.bf16.mxu0 %v1152_v62  ;;  %3030 = vmatprep.mubr.bf16.mxu1 %v1152_v62  ;;  %v1131_v62 = vadd.f32 %v5330_v61, %v320_v14  ;;  %v4781_v61 = vld [vmem:[#allocation7 + $0x48] sm:$0xff]  }
 0x249   :  { %2837 = vmatpush1.bf16.msra.mxu0 %v4687_v19  ;;  %3001 = vmatpush1.bf16.msra.mxu1 %v4690_v20  ;;  %v4773_v19 = vld [vmem:[#allocation6 + $0x7e4] ss:$16 sps:$4 sm:$0xff]   ;;  %v4776_v20 = vld [vmem:[#allocation6 + $0x7ec] ss:$16 sps:$4 sm:$0xff]  }
 0x24a   :  { %2838 = vmatprep.subr.bf16.mxu0 %v4695_v21  ;;  %3002 = vmatprep.subr.bf16.mxu1 %v4698_v22  ;;  %v4771_v21 = vld [vmem:[#allocation6 + $0x7e0] ss:$16 sps:$4 sm:$0xff]   ;;  %v4774_v22 = vld [vmem:[#allocation6 + $0x7e8] ss:$16 sps:$4 sm:$0xff]  }
 0x24d   :  { %2839 = vmatpush1.bf16.msra.mxu0 %v4693_v26  ;;  %3003 = vmatpush1.bf16.msra.mxu1 %v4696_v27  ;;  %v1143_v26 = vmax.f32 %v1131_v62, 0.0  ;;  %v4778_v27 = vld [vmem:[#allocation7 + $0xc0] sm:$0xff]  }
 0x24e   :  { %2840 = vmatprep.subr.bf16.mxu0 %v4701_v28  ;;  %3004 = vmatprep.subr.bf16.mxu1 %v4704_v29  ;;  %v4779_v28 = vld [vmem:[#allocation7] sm:$0xff]  }
 0x24f   :  { %v4780_v29 = vld [vmem:[#allocation7 + $0x80] sm:$0xff]  }
 0x251   :  { %2841 = vmatpush1.bf16.msra.mxu0 %v4699_v2  ;;  %3005 = vmatpush1.bf16.msra.mxu1 %v4702_v30  ;;  %v1151_v2 = vpack.c.bf16 %v1143_v26, %v1143_v26  ;;  %v4782_v30 = vld [vmem:[#allocation7 + $0xc8] sm:$0xff]  }
 0x252   :  { %2842 = vmatprep.subr.bf16.mxu0 %v4707_v31  ;;  %3006 = vmatprep.subr.bf16.mxu1 %v4710_v32  ;;  %v4783_v31 = vld [vmem:[#allocation7 + $0x8] sm:$0xff]  }
 0x253   :  { %v4784_v32 = vld [vmem:[#allocation7 + $0x88] sm:$0xff]  }
 0x254   :  { %v4811_v26 = vld [vmem:[%s5412_s7 + $0x10] sm:$0xff]  }
 0x255   :  { %2843 = vmatpush1.bf16.msra.mxu0 %v4705_v33  ;;  %3007 = vmatpush1.bf16.msra.mxu1 %v4708_v34  ;;  %v4785_v33 = vld [vmem:[#allocation7 + $0x50] sm:$0xff]  }
 0x256   :  { %2844 = vmatprep.subr.bf16.mxu0 %v4713_v35  ;;  %3008 = vmatprep.subr.bf16.mxu1 %v4716_v37  ;;  %v4786_v34 = vld [vmem:[#allocation7 + $0xd0] sm:$0xff]  }
 0x257   :  { %v4787_v35 = vld [vmem:[#allocation7 + $0x10] sm:$0xff]  }
 0x258   :  { %v4788_v37 = vld [vmem:[#allocation7 + $0x90] sm:$0xff]  }
 0x259   :  { %2845 = vmatpush1.bf16.msra.mxu0 %v4711_v38  ;;  %3009 = vmatpush1.bf16.msra.mxu1 %v4714_v39  ;;  %v4789_v38 = vld [vmem:[#allocation7 + $0x58] sm:$0xff]  }
 0x25a   :  { %2846 = vmatprep.subr.bf16.mxu0 %v4719_v40  ;;  %3010 = vmatprep.subr.bf16.mxu1 %v4722_v41  ;;  %v4790_v39 = vld [vmem:[#allocation7 + $0xd8] sm:$0xff]  }
 0x25b   :  { %v4791_v40 = vld [vmem:[#allocation7 + $0x18] sm:$0xff]  }
 0x25c   :  { %v4792_v41 = vld [vmem:[#allocation7 + $0x98] sm:$0xff]  }
 0x25d   :  { %2847 = vmatpush1.bf16.msra.mxu0 %v4717_v43  ;;  %3011 = vmatpush1.bf16.msra.mxu1 %v4720_v44  ;;  %v4793_v43 = vld [vmem:[#allocation7 + $0x60] sm:$0xff]  }
 0x25e   :  { %2848 = vmatprep.subr.bf16.mxu0 %v4725_v45  ;;  %3012 = vmatprep.subr.bf16.mxu1 %v4728_v46  ;;  %v4794_v44 = vld [vmem:[#allocation7 + $0xe0] sm:$0xff]  }
 0x25f   :  { %v4795_v45 = vld [vmem:[#allocation7 + $0x20] sm:$0xff]  }
 0x260   :  { %v4796_v46 = vld [vmem:[#allocation7 + $0xa0] sm:$0xff]  }
 0x261   :  { %2849 = vmatpush1.bf16.msra.mxu0 %v4723_v47  ;;  %3013 = vmatpush1.bf16.msra.mxu1 %v4726_v36  ;;  %v4797_v47 = vld [vmem:[#allocation7 + $0x68] sm:$0xff]  }
 0x262   :  { %2850 = vmatprep.subr.bf16.mxu0 %v4731_v48  ;;  %3014 = vmatprep.subr.bf16.mxu1 %v4734_v49  ;;  %v4798_v36 = vld [vmem:[#allocation7 + $0xe8] sm:$0xff]  }
 0x263   :  { %v4799_v48 = vld [vmem:[#allocation7 + $0x28] sm:$0xff]  }
 0x264   :  { %v4800_v49 = vld [vmem:[#allocation7 + $0xa8] sm:$0xff]  }
 0x265   :  { %2851 = vmatpush1.bf16.msra.mxu0 %v4729_v23  ;;  %3015 = vmatpush1.bf16.msra.mxu1 %v4732_v50  ;;  %v4801_v23 = vld [vmem:[#allocation7 + $0x70] sm:$0xff]  }
 0x266   :  { %2852 = vmatprep.subr.bf16.mxu0 %v4737_v51  ;;  %3016 = vmatprep.subr.bf16.mxu1 %v4740_v52  ;;  %v4802_v50 = vld [vmem:[#allocation7 + $0xf0] sm:$0xff]  }
 0x267   :  { %v4803_v51 = vld [vmem:[#allocation7 + $0x30] sm:$0xff]  }
 0x268   :  { %v4804_v52 = vld [vmem:[#allocation7 + $0xb0] sm:$0xff]  }
 0x269   :  { %2853 = vmatpush1.bf16.msra.mxu0 %v4735_v53  ;;  %3017 = vmatpush1.bf16.msra.mxu1 %v4738_v54  ;;  %v4805_v53 = vld [vmem:[#allocation7 + $0x78] sm:$0xff]  }
 0x26a   :  { %2854 = vmatprep.subr.bf16.mxu0 %v4743_v55  ;;  %3018 = vmatprep.subr.bf16.mxu1 %v4746_v56  ;;  %v4806_v54 = vld [vmem:[#allocation7 + $0xf8] sm:$0xff]  }
 0x26b   :  { %v4807_v55 = vld [vmem:[#allocation7 + $0x38] sm:$0xff]  }
 0x26c   :  { %v4808_v56 = vld [vmem:[#allocation7 + $0xb8] sm:$0xff]  }
 0x26d   :  { %2855 = vmatpush1.bf16.msra.mxu0 %v4741_v57  ;;  %3019 = vmatpush1.bf16.msra.mxu1 %v4744_v58  ;;  %v5082_v57 = vmov 0.0   ;;  %v1409_v58 = vld [vmem:[%s5409_s4] sm:$0xf] }
 0x26e   :  { %2856 = vmatprep.subr.bf16.mxu0 %v4749_v59  ;;  %3020 = vmatprep.subr.bf16.mxu1 %v4752_v60  ;;  %v1414_v59 = vrot.slane %v1409_v58, %v5304_v11  ;;  %v1422_v60 = vrot.slane %v1409_v58, %v303_v24 }
 0x271   :  { %2857 = vmatpush1.bf16.msra.mxu0 %v4747_v63  ;;  %3021 = vmatpush1.bf16.msra.mxu1 %v4750_v0  ;;  %v1418_v63 = vrot.slane %v1409_v58, %v5309_v13  ;;  %v1426_v0 = vrot.slane %v1409_v58, %v307_v25  ;;  %v4831_v58 = vld [vmem:[#allocation15 + $0x20] ss:$8 sps:$4 sm:$0xff]  }
 0x272   :  { %2858 = vmatprep.subr.bf16.mxu0 %v4755_v1  ;;  %3022 = vmatprep.subr.bf16.mxu1 %v4758_v3 }
 0x275   :  { %2859 = vmatpush1.bf16.msra.mxu0 %v4753_v4  ;;  %3023 = vmatpush1.bf16.msra.mxu1 %v4756_v5 }
 0x276   :  { %2860 = vmatprep.subr.bf16.mxu0 %v4761_v7  ;;  %3024 = vmatprep.subr.bf16.mxu1 %v4764_v8 }
 0x279   :  { %2861 = vmatpush1.bf16.msra.mxu0 %v4759_v9  ;;  %3025 = vmatpush1.bf16.msra.mxu1 %v4762_v42 }
 0x27a   :  { %2862 = vmatprep.subr.bf16.mxu0 %v4767_v15  ;;  %3026 = vmatprep.subr.bf16.mxu1 %v4770_v16 }
 0x27d   :  { %2863 = vmatpush1.bf16.msra.mxu0 %v4765_v17  ;;  %3027 = vmatpush1.bf16.msra.mxu1 %v4768_v18 }
 0x27e   :  { %2864 = vmatprep.subr.bf16.mxu0 %v4773_v19  ;;  %3028 = vmatprep.subr.bf16.mxu1 %v4776_v20 }
 0x281   :  { %2865 = vmatpush1.bf16.msra.mxu0 %v4771_v21  ;;  %3029 = vmatpush1.bf16.msra.mxu1 %v4774_v22  ;;  %v4810_v22 = vld [vmem:[%s5412_s7 + $0x8] sm:$0xff]  }
 0x282   :  { %4243 = vmatprep.subr.bf16.mxu0 %v4777_v12  ;;  %4265 = vmatprep.subr.bf16.mxu1 %v4778_v27  ;;  %v4812_v12 = vld [vmem:[%s5412_s7 + $0x18] sm:$0xff]   ;;  %v4813_v27 = vld [vmem:[%s5412_s7 + $0x20] sm:$0xff]  }
 0x284   :  { %2867 = vmatmul.mubr.bf16.vlgmr.msra.gmra.mrb[8].mxu0 %v1151_v2  ;;  %3031 = vmatmul.mubr.bf16.vlgmr.msra.gmra.mrb[8].mxu1 %v1151_v2  ;;  %v4816_v2 = vld [vmem:[%s5412_s7 + $0x38] sm:$0xff]  }
 0x285   :  { %4244 = vmatpush3.bf16.msra.mxu0 %v4779_v28  ;;  %4266 = vmatpush3.bf16.msra.mxu1 %v4780_v29  ;;  %v4814_v28 = vld [vmem:[%s5412_s7 + $0x28] sm:$0xff]   ;;  %v4815_v29 = vld [vmem:[%s5412_s7 + $0x30] sm:$0xff]  }
 0x286   :  { %4245 = vmatprep.subr.bf16.mxu0 %v4781_v61  ;;  %4267 = vmatprep.subr.bf16.mxu1 %v4782_v30  ;;  %v4817_v61 = vld [vmem:[#allocation12] sm:$0xff]   ;;  %v4818_v30 = vld [vmem:[#allocation12 + $0x8] sm:$0xff]  }
 0x289   :  { %4246 = vmatpush3.bf16.msra.mxu0 %v4783_v31  ;;  %4268 = vmatpush3.bf16.msra.mxu1 %v4784_v32  ;;  %v4819_v31 = vld [vmem:[#allocation12 + $0x10] sm:$0xff]   ;;  %v4820_v32 = vld [vmem:[#allocation12 + $0x18] sm:$0xff]  }
 0x28a   :  { %4247 = vmatprep.subr.bf16.mxu0 %v4785_v33  ;;  %4269 = vmatprep.subr.bf16.mxu1 %v4786_v34  ;;  %v4821_v33 = vld [vmem:[#allocation12 + $0x20] sm:$0xff]   ;;  %v4822_v34 = vld [vmem:[#allocation12 + $0x28] sm:$0xff]  }
 0x28d   :  { %4248 = vmatpush3.bf16.msra.mxu0 %v4787_v35  ;;  %4270 = vmatpush3.bf16.msra.mxu1 %v4788_v37 }
 0x28e   :  { %4249 = vmatprep.subr.bf16.mxu0 %v4789_v38  ;;  %4271 = vmatprep.subr.bf16.mxu1 %v4790_v39  ;;  %v4174_v38 = vld [vmem:[#allocation9] ss:$0 sm:$0xff] }
 0x291   :  { %4250 = vmatpush3.bf16.msra.mxu0 %v4791_v40  ;;  %4272 = vmatpush3.bf16.msra.mxu1 %v4792_v41 }
 0x292   :  { %4251 = vmatprep.subr.bf16.mxu0 %v4793_v43  ;;  %4273 = vmatprep.subr.bf16.mxu1 %v4794_v44 }
 0x295   :  { %4252 = vmatpush3.bf16.msra.mxu0 %v4795_v45  ;;  %4274 = vmatpush3.bf16.msra.mxu1 %v4796_v46 }
 0x296   :  { %4253 = vmatprep.subr.bf16.mxu0 %v4797_v47  ;;  %4275 = vmatprep.subr.bf16.mxu1 %v4798_v36 }
 0x299   :  { %4254 = vmatpush3.bf16.msra.mxu0 %v4799_v48  ;;  %4276 = vmatpush3.bf16.msra.mxu1 %v4800_v49 }
 0x29a   :  { %4255 = vmatprep.subr.bf16.mxu0 %v4801_v23  ;;  %4277 = vmatprep.subr.bf16.mxu1 %v4802_v50  ;;  %v4823_v50 = vld [vmem:[#allocation12 + $0x30] sm:$0xff]  }
 0x29d   :  { %4256 = vmatpush3.bf16.msra.mxu0 %v4803_v51  ;;  %4278 = vmatpush3.bf16.msra.mxu1 %v4804_v52  ;;  %v4824_v51 = vld [vmem:[#allocation12 + $0x38] sm:$0xff]   ;;  %v4825_v52 = vld [vmem:[#allocation15] ss:$8 sps:$4 sm:$0xff]  }
 0x29e   :  { %4257 = vmatprep.subr.bf16.mxu0 %v4805_v53  ;;  %4279 = vmatprep.subr.bf16.mxu1 %v4806_v54  ;;  %v4827_v53 = vld [vmem:[#allocation15 + $0x4] ss:$8 sps:$4 sm:$0xff]   ;;  %v4830_v54 = vld [vmem:[#allocation15 + $0x14] ss:$8 sps:$4 sm:$0xff]  }
 0x2a1   :  { %4258 = vmatpush3.bf16.msra.mxu0 %v4807_v55  ;;  %4280 = vmatpush3.bf16.msra.mxu1 %v4808_v56  ;;  %v4828_v55 = vld [vmem:[#allocation15 + $0x10] ss:$8 sps:$4 sm:$0xff]   ;;  %v4833_v56 = vld [vmem:[#allocation15 + $0x24] ss:$8 sps:$4 sm:$0xff]  }
 0x2a2   :  { %4305 = vmatprep.subr.bf16.mxu0 %v5082_v57  ;;  %4325 = vmatprep.subr.bf16.mxu1 %v5082_v57 }
 0x357   :  { %v2868_v1 = vpop.f32.mrb[8].mxu0  ;;  %v3032_v3 = vpop.f32.mrb[8].mxu1 }
 0x358   :  { %v4345_v4 = vadd.f32 %v2868_v1, %v1414_v59  ;;  %v4347_v5 = vadd.f32 %v3032_v3, %v1422_v60  ;;  %v2870_v6 = vpop.f32.mrb[9].mxu0  ;;  %v3034_v7 = vpop.f32.mrb[9].mxu1  ;;  %v4836_v59 = vld [vmem:[#allocation15 + $0x34] ss:$8 sps:$4 sm:$0xff]   ;;  %v4834_v60 = vld [vmem:[#allocation15 + $0x30] ss:$8 sps:$4 sm:$0xff]  }
 0x359   :  { %v4346_v8 = vadd.f32 %v2870_v6, %v1418_v63  ;;  %v4348_v9 = vadd.f32 %v3034_v7, %v1426_v0  ;;  %v2872_v42 = vpop.f32.mrb[10].mxu0  ;;  %v3036_v14 = vpop.f32.mrb[10].mxu1  ;;  %v4839_v63 = vld [vmem:[#allocation15 + $0x44] ss:$8 sps:$4 sm:$0xff]   ;;  %v4842_v0 = vld [vmem:[#allocation15 + $0x54] ss:$8 sps:$4 sm:$0xff]  }
 0x35a   :  { %v3039_v15 = vmax.f32 %v4345_v4, 0.0  ;;  %v3041_v16 = vmax.f32 %v4347_v5, 0.0  ;;  %v2873_v17 = vpop.f32.mrb[11].mxu0  ;;  %v3037_v18 = vpop.f32.mrb[11].mxu1  ;;  %v4840_v1 = vld [vmem:[#allocation15 + $0x50] ss:$8 sps:$4 sm:$0xff]  }
 0x35b   :  { %v3040_v24 = vmax.f32 %v4346_v8, 0.0  ;;  %v3042_v62 = vmax.f32 %v4348_v9, 0.0  ;;  %v4845_v3 = vld [vmem:[#allocation15 + $0x64] ss:$8 sps:$4 sm:$0xff]   ;;  %v4843_v4 = vld [vmem:[#allocation15 + $0x60] ss:$8 sps:$4 sm:$0xff]  }
 0x35c   :  { %v3043_v25 = vpack.c.bf16 %v3039_v15, %v3039_v15  ;;  %v3045_v21 = vpack.c.bf16 %v3041_v16, %v3041_v16  ;;  %v4207_v5 = vld [vmem:[#allocation10] ss:$0 sm:$0xff]  ;;  %v4846_v17 = vld [vmem:[#allocation15 + $0x70] ss:$8 sps:$4 sm:$0xff]   ;;  %v5084_v18 = vmov 0  }
 0x35d   :  { %v3044_v19 = vpack.c.bf16 %v3040_v24, %v3040_v24  ;;  %v3046_v20 = vpack.c.bf16 %v3042_v62, %v3042_v62  ;;  %v4848_v16 = vld [vmem:[#allocation15 + $0x74] ss:$8 sps:$4 sm:$0xff]  }
 0x35e   :  { %v4216_v24 = vld [vmem:[#allocation13] ss:$0 sm:$0xff] }
 0x35f   :  { %3342 = vmatprep.mubr.bf16.mxu0 %v3044_v19  ;;  %3382 = vmatprep.mubr.bf16.mxu1 %v3046_v20 }
 0x360   :  { %3343 = vmatmul.mubr.bf16.vlgmr.msra.gmra.mrb[12].mxu0 %v3043_v25  ;;  %3383 = vmatmul.mubr.bf16.vlgmr.msra.gmra.mrb[12].mxu1 %v3045_v21 }
 0x361   :  { %4306 = vmatpush3.bf16.msra.mxu0 %v4809_v10  ;;  %4321 = vmatprep.mubr.msk.bf16.mxu0 %vm5083_vm0, %v5082_v57 }
 0x362   :  { %4307 = vmatprep.subr.bf16.mxu0 %v5082_v57  ;;  %4341 = vmatprep.mubr.msk.bf16.mxu1 %vm5083_vm0, %v5082_v57 }
 0x363   :  { %4326 = vmatpush3.bf16.msra.mxu1 %v4817_v61 }
 0x364   :  { %4327 = vmatprep.subr.bf16.mxu1 %v5082_v57 }
 0x365   :  { %4308 = vmatpush3.bf16.msra.mxu0 %v4810_v22 }
 0x366   :  { %4309 = vmatprep.subr.bf16.mxu0 %v5082_v57 }
 0x367   :  { %4328 = vmatpush3.bf16.msra.mxu1 %v4818_v30 }
 0x368   :  { %4329 = vmatprep.subr.bf16.mxu1 %v5082_v57 }
 0x369   :  { %4310 = vmatpush3.bf16.msra.mxu0 %v4811_v26  ;;  %v3634_v26 = vld [vmem:[%s5417_s12] sm:$0x3] }
 0x36a   :  { %4311 = vmatprep.subr.bf16.mxu0 %v5082_v57 }
 0x36b   :  { %4330 = vmatpush3.bf16.msra.mxu1 %v4819_v31 }
 0x36c   :  { %4331 = vmatprep.subr.bf16.mxu1 %v5082_v57 }
 0x36d   :  { %4312 = vmatpush3.bf16.msra.mxu0 %v4812_v12  ;;  %v3639_v12 = vrot.slane %v3634_v26, %v5304_v11 }
 0x36e   :  { %4313 = vmatprep.subr.bf16.mxu0 %v5082_v57 }
 0x36f   :  { %4332 = vmatpush3.bf16.msra.mxu1 %v4820_v32 }
 0x370   :  { %4333 = vmatprep.subr.bf16.mxu1 %v5082_v57 }
 0x371   :  { %4314 = vmatpush3.bf16.msra.mxu0 %v4813_v27  ;;  %v3643_v27 = vrot.slane %v3634_v26, %v5309_v13 }
 0x372   :  { %4315 = vmatprep.subr.bf16.mxu0 %v5082_v57 }
 0x373   :  { %4334 = vmatpush3.bf16.msra.mxu1 %v4821_v33 }
 0x374   :  { %4335 = vmatprep.subr.bf16.mxu1 %v5082_v57 }
 0x375   :  { %4316 = vmatpush3.bf16.msra.mxu0 %v4814_v28 }
 0x376   :  { %4317 = vmatprep.subr.bf16.mxu0 %v5082_v57 }
 0x377   :  { %4336 = vmatpush3.bf16.msra.mxu1 %v4822_v34 }
 0x378   :  { %4337 = vmatprep.subr.bf16.mxu1 %v5082_v57 }
 0x379   :  { %4318 = vmatpush3.bf16.msra.mxu0 %v4815_v29 }
 0x37a   :  { %4319 = vmatprep.subr.bf16.mxu0 %v5082_v57 }
 0x37b   :  { %4338 = vmatpush3.bf16.msra.mxu1 %v4823_v50 }
 0x37c   :  { %4339 = vmatprep.subr.bf16.mxu1 %v5082_v57  ;;  %v4837_v57 = vld [vmem:[#allocation15 + $0x40] ss:$8 sps:$4 sm:$0xff]  }
 0x37d   :  { %4320 = vmatpush3.bf16.msra.mxu0 %v4816_v2 }
 0x37e   :  { %3726 = vmatprep.subr.bf16.mxu0 %v4827_v53 }
 0x37f   :  { %4340 = vmatpush3.bf16.msra.mxu1 %v4824_v51 }
 0x433   :  { %v4259_v35 = vpop.f32.mrb[12].mxu0  ;;  %v4281_v37 = vpop.f32.mrb[12].mxu1 }
 0x434   :  { %v4260_v39 = vpop.f32.mrb[13].mxu0  ;;  %v4282_v40 = vpop.f32.mrb[13].mxu1 }
 0x435   :  { %v4261_v41 = vadd.f32 %v4260_v39, %v4259_v35  ;;  %v4283_v43 = vadd.f32 %v4282_v40, %v4281_v37  ;;  %v4262_v44 = vpop.f32.mrb[14].mxu0  ;;  %v4284_v45 = vpop.f32.mrb[14].mxu1 }
 0x436   :  { %v4263_v46 = vpop.f32.mrb[15].mxu0  ;;  %v4285_v47 = vpop.f32.mrb[15].mxu1 }
 0x437   :  { %v3345_v36 = vadd.f32 %v4261_v41, %v4174_v38 }
 0x439   :  { %v3385_v48 = vadd.f32 %v4283_v43, %v3345_v36 }
 0x43b   :  { %v3390_v49 = vmax.f32 %v3385_v48, 0.0 }
 0x43d   :  { %v3391_v23 = vpack.c.bf16 %v3390_v49, %v3390_v49 }
 0x43f   :  { %4322 = vmatmul.mubr.bf16.vlgmr.msra.gmra.mrb[16].mxu0 %v3391_v23 }
 0x440   :  { %3727 = vmatpush1.bf16.msra.mxu0 %v4825_v52  ;;  %3758 = vmatprep.mubr.bf16.mxu0 %v5084_v18 }
 0x441   :  { %3728 = vmatprep.subr.bf16.mxu0 %v4830_v54 }
 0x444   :  { %3729 = vmatpush1.bf16.msra.mxu0 %v4828_v55 }
 0x445   :  { %3730 = vmatprep.subr.bf16.mxu0 %v4833_v56 }
 0x448   :  { %3731 = vmatpush1.bf16.msra.mxu0 %v4831_v58 }
 0x449   :  { %3732 = vmatprep.subr.bf16.mxu0 %v4836_v59 }
 0x44c   :  { %3733 = vmatpush1.bf16.msra.mxu0 %v4834_v60 }
 0x44d   :  { %3734 = vmatprep.subr.bf16.mxu0 %v4839_v63 }
 0x450   :  { %3735 = vmatpush1.bf16.msra.mxu0 %v4837_v57 }
 0x451   :  { %3736 = vmatprep.subr.bf16.mxu0 %v4842_v0 }
 0x454   :  { %3737 = vmatpush1.bf16.msra.mxu0 %v4840_v1 }
 0x455   :  { %3738 = vmatprep.subr.bf16.mxu0 %v4845_v3 }
 0x458   :  { %3739 = vmatpush1.bf16.msra.mxu0 %v4843_v4 }
 0x459   :  { %3740 = vmatprep.subr.bf16.mxu0 %v4848_v16 }
 0x45c   :  { %3741 = vmatpush1.bf16.msra.mxu0 %v4846_v17 }
 0x512   :  { %v3497_v6 = vpop.f32.mrb[16].mxu0 }
 0x513   :  { %v3498_v7 = vadd.f32 %v4207_v5, %v3497_v6  ;;  %v4323_v8 = vpop.f32.mrb[17].mxu0 }
 0x514   :  { %v3500_v9 = vpop.f32.mrb[18].mxu0 }
 0x515   :  { %v3503_v42 = vmax.f32 %v3498_v7, 0.0  ;;  %v4324_v14 = vpop.f32.mrb[19].mxu0 }
 0x517   :  { %v3504_v15 = vpack.c.bf16 %v3503_v42, %v3503_v42 }
 0x519   :  { %4342 = vmatmul.mubr.bf16.vlgmr.msra.gmra.mrb[16].mxu1 %v3504_v15 }
 0x5ec   :  { %v3610_v62 = vpop.f32.mrb[16].mxu1 }
 0x5ed   :  { %v3611_v19 = vadd.f32 %v4216_v24, %v3610_v62  ;;  %v4343_v20 = vpop.f32.mrb[17].mxu1 }
 0x5ee   :  { %v3613_v10 = vpop.f32.mrb[18].mxu1 }
 0x5ef   :  { %v3616_v25 = vmax.f32 %v3611_v19, 0.0  ;;  %v4344_v21 = vpop.f32.mrb[19].mxu1 }
 0x5f1   :  { %v3617_v22 = vpack.c.bf16 %v3616_v25, %v3616_v25 }
 0x5f3   :  { %3759 = vmatmul.mubr.bf16.vlgmr.msra.gmra.mrb[20].mxu0 %v3617_v22 }
 0x6c6   :  { %v3760_v28 = vpop.f32.mrb[20].mxu0 }
 0x6c7   :  { %v3761_v29 = vadd.f32 %v3760_v28, %v3639_v12  ;;  %v3762_v2 = vpop.f32.mrb[21].mxu0 }
 0x6c8   :  { %v3763_v61 = vadd.f32 %v3762_v2, %v3643_v27  ;;  %v3764_v30 = vpop.f32.mrb[22].mxu0 }
 0x6c9   :  { %v4241_v31 = vmul.f32 -1.442695, %v3761_v29  ;;  %v3765_v32 = vpop.f32.mrb[23].mxu0 }
 0x6ca   :  { %v4242_v33 = vmul.f32 -1.442695, %v3763_v61 }
 0x6cb   :  { %4849 = vpow2.f32 %v4241_v31 }
 0x6cc   :  { %4851 = vpow2.f32 %v4242_v33 }
 0x6d5   :  { %v4850_v34 = vpop.eup %4849 }
 0x6d6   :  { %v4852_v35 = vpop.eup %4851  ;;  %v3773_v37 = vadd.f32 1.0, %v4850_v34 }
 0x6d7   :  { %v3774_v38 = vadd.f32 1.0, %v4852_v35 }
 0x6d8   :  { %4853 = vrcp.f32 %v3773_v37 }
 0x6d9   :  { %4855 = vrcp.f32 %v3774_v38 }
 0x6e2   :  { %v4854_v39 = vpop.eup %4853 }
 0x6e3   :  { %v4856_v11 = vpop.eup %4855  ;;  %3779 = vst [vmem:[%s5418_s13] sm:$0xff] %v4854_v39 }
 0x6e4   :  { %3780 = vst [vmem:[%s5418_s13 + $0x8] sm:$0xff] %v4856_v11 }
 0x6e5   :  { %3785 = vsyncpa [#allocation3], 1 }
 0x6e6   :  { %3786 = vsyncpa [#allocation5], 1 }
 0x6e7   :  { %3787 = vsyncpa [#allocation8], 1 }
 0x6e8   :  { %3788 = vsyncpa [#allocation11], 1 }
 0x6e9   :  { %3789 = vsyncpa [#allocation14], 1 }

</bundles_post_ra>
